<compile_context>
chip_gen: v5e
topology: v5e:2x2
jax: 0.10.0
libtpu: 0.0.40
codegen_flags: <defaults>
</compile_context>

<pallas_src>
import functools

import jax
import jax.numpy as jnp
from jax.experimental import pallas as pl
from jax.experimental.pallas import tpu as pltpu

_LANE = 128


def _round_up(x, m):
    return (x + m - 1) // m * m


def _pick_row_tile(H, W, cap=512, prefer_multi=False):
    """Largest divisor TH of H with TH*W <= cap and (TH*W) % 8 == 0."""
    cands = [th for th in range(1, H + 1)
             if H % th == 0 and th * W <= cap and (th * W) % 8 == 0]
    if not cands:
        # Fall back to one full-height tile if that is still sublane-aligned.
        return H if (H * W) % 8 == 0 else None
    if prefer_multi:
        multi = [th for th in cands if H // th >= 2]
        if multi:
            return max(multi)
    return max(cands)


def _pick_vmem_limit_bytes():
    """~3/4 of physical VMEM: ~96 MiB on v5e/v6e (128 MiB), ~48 MiB on v7x (64 MiB)."""
    try:
        phys = int(pltpu.get_tpu_info().vmem_capacity_bytes)
        return min(phys * 3 // 4, 100 * 1024 * 1024)
    except Exception:
        return 48 * 1024 * 1024   # safe on every generation


def _conv_bn_relu_kernel(x_ref, w_ref, bias_ref, o_ref, *, TH, W, K):
    # x_ref:    (1, Hp, Wp, Cin_p)   padded NHWC image (resident across c/h tiles)
    # w_ref:    (K, K*Cin_p, TC)     BN-scale-folded weights, kw folded into depth
    # bias_ref: (1, TC)              folded BN bias (f32)
    # o_ref:    (1, TH*W, TC)        lane-dense output slab for this (h, c) tile
    h = pl.program_id(2)
    row0 = pl.multiple_of(h * TH, TH)
    cin_p = x_ref.shape[-1]

    acc = None
    for kh in range(K):
        # Concatenate the K kw-shifts along the contraction dim -> one deep
        # matmul per kh (depth K*Cin_p) instead of K shallow ones.
        taps = [
            x_ref[0, pl.ds(row0 + kh, TH), kw:kw + W, :].reshape(TH * W, cin_p)
            for kw in range(K)
        ]
        patch = jnp.concatenate(taps, axis=-1) if K > 1 else taps[0]
        if patch.dtype != w_ref.dtype:
            patch = patch.astype(w_ref.dtype)        # mxu_dtype knob
        contrib = jnp.dot(patch, w_ref[kh], preferred_element_type=jnp.float32)
        acc = contrib if acc is None else acc + contrib   # value accumulation (no scratch)

    y = acc + bias_ref[...]                               # f32 epilogue
    o_ref[0] = jnp.maximum(y, 0.0).astype(o_ref.dtype)


def conv_bn_relu(x_nchw, weight_oihw, gamma, beta, running_mean, running_var,
                 eps=1e-5, mxu_dtype=None):
    """x_nchw: (N, Cin, H, W); weight_oihw: (Cout, Cin, K, K). Returns NCHW."""
    N, Cin, H, W = x_nchw.shape
    Cout, _, K, _ = weight_oihw.shape
    assert K % 2 == 1
    pad = K // 2                         # pad=1 for k=3 (module default)

    Cin_p = _round_up(Cin, _LANE)
    Cout_p = _round_up(Cout, _LANE)
    TC = 256 if Cout_p % 256 == 0 else _LANE          # Cout tile (MXU-width on v6e/v7x)
    TH = _pick_row_tile(H, W, cap=512, prefer_multi=(N == 1))
    assert TH is not None, (
        "conv_bn_relu: H*W must be a multiple of 8 for the lane-dense flat "
        "output layout")                  # TODO(synk): pad H*W for odd shapes
    Hp, Wp = H + 2 * pad, W + 2 * pad

    in_dtype = x_nchw.dtype
    compute_dtype = mxu_dtype if mxu_dtype is not None else in_dtype

    # --- glue (plain JAX): layout, padding, BN folding into weights ---
    x_nhwc = jnp.transpose(x_nchw, (0, 2, 3, 1))                       # NHWC
    x_p = jnp.pad(x_nhwc, ((0, 0), (pad, pad), (pad, pad), (0, Cin_p - Cin)))

    scale = gamma / jnp.sqrt(running_var + eps)                        # (Cout,)
    bias = beta - running_mean * scale                                 # (Cout,)
    w_hwio = jnp.transpose(weight_oihw, (2, 3, 1, 0))                  # (K,K,Cin,Cout)
    w_folded = w_hwio * scale                                          # fold BN scale
    w_p = jnp.pad(w_folded,
                  ((0, 0), (0, 0), (0, Cin_p - Cin), (0, Cout_p - Cout)))
    # (K, K, Cin_p, Cout_p) -> (K, K*Cin_p, Cout_p): kw folded into contraction,
    # matching the in-kernel concat order (kw-major, then cin).
    w_p = w_p.reshape(K, K * Cin_p, Cout_p).astype(compute_dtype)
    bias_p = jnp.pad(bias, (0, Cout_p - Cout)).reshape(1, Cout_p).astype(jnp.float32)

    kernel = functools.partial(_conv_bn_relu_kernel, TH=TH, W=W, K=K)

    grid = (N, Cout_p // TC, H // TH)        # weights resident across inner h axis

    out = pl.pallas_call(
        kernel,
        out_shape=jax.ShapeDtypeStruct((N, H * W, Cout_p), in_dtype),
        grid_spec=pltpu.PrefetchScalarGridSpec(
            num_scalar_prefetch=0,
            grid=grid,
            in_specs=[
                # Whole padded image: block index only depends on n, so it is
                # DMA'd once per image and stays resident across c/h tiles.
                pl.BlockSpec((1, Hp, Wp, Cin_p), lambda n, c, h: (n, 0, 0, 0)),
                pl.BlockSpec((K, K * Cin_p, TC), lambda n, c, h: (0, 0, c)),
                pl.BlockSpec((1, TC), lambda n, c, h: (0, c)),
            ],
            out_specs=pl.BlockSpec((1, TH * W, TC), lambda n, c, h: (n, h, c)),
        ),
        compiler_params=pltpu.CompilerParams(
            # Batch-first megacore split: an h/c split would make both v7x
            # TensorCores DMA the identical full image.
            dimension_semantics=("parallel", "arbitrary", "arbitrary"),
            vmem_limit_bytes=_pick_vmem_limit_bytes(),
        ),
    )(x_p, w_p, bias_p)

    out = out.reshape(N, H, W, Cout_p)[..., :Cout]       # drop channel padding
    return jnp.transpose(out, (0, 3, 1, 2))               # back to NCHW


def _reference(x_nchw, weight_oihw, gamma, beta, running_mean, running_var,
               eps=1e-5):
    y = jax.lax.conv_general_dilated(
        x_nchw, weight_oihw, window_strides=(1, 1), padding=((1, 1), (1, 1)),
        dimension_numbers=("NCHW", "OIHW", "NCHW"))
    scale = gamma / jnp.sqrt(running_var + eps)
    bias = beta - running_mean * scale
    y = y * scale[None, :, None, None] + bias[None, :, None, None]
    return jnp.maximum(y, 0.0)


if __name__ == "__main__":
    key = jax.random.PRNGKey(0)
    k_x, k_w, k_g, k_b, k_m, k_v = jax.random.split(key, 6)

    N, Cin, Cout, H, W, K = 2, 4, 8, 16, 16, 3

    x = jax.random.normal(k_x, (N, Cin, H, W), dtype=jnp.float32)
    weight = jax.random.normal(k_w, (Cout, Cin, K, K), dtype=jnp.float32) * 0.1
    gamma = 1.0 + 0.1 * jax.random.normal(k_g, (Cout,), dtype=jnp.float32)
    beta = 0.1 * jax.random.normal(k_b, (Cout,), dtype=jnp.float32)
    running_mean = 0.1 * jax.random.normal(k_m, (Cout,), dtype=jnp.float32)
    running_var = jnp.abs(1.0 + 0.1 * jax.random.normal(k_v, (Cout,),
                                                        dtype=jnp.float32))

    # f32 MXU path keeps the tight tolerance; pass mxu_dtype=jnp.bfloat16 for
    # ~2-4x MXU throughput when the model tolerates it (loosen tolerance).
    out = conv_bn_relu(x, weight, gamma, beta, running_mean, running_var)
    out = jax.block_until_ready(out)

    ref = _reference(x, weight, gamma, beta, running_mean, running_var)
    assert out.shape == (N, Cout, H, W)
    assert out.dtype == x.dtype
    assert jnp.max(jnp.abs(out - ref)) < 1e-4

    print("KERNEL_OK")
</pallas_src>

<mosaic_0001>
module attributes {stable_mosaic.version = 11 : i64} {
  func.func @_conv_bn_relu_kernel(%arg0: i32, %arg1: i32, %arg2: i32, %arg3: memref<1x18x18x128xf32, #tpu.memory_space<vmem>>, %arg4: memref<3x384x128xf32, #tpu.memory_space<vmem>>, %arg5: memref<1x128xf32, #tpu.memory_space<vmem>>, %arg6: memref<1x256x128xf32, #tpu.memory_space<vmem>>) attributes {dimension_semantics = [#tpu.dimension_semantics<parallel>, #tpu.dimension_semantics<arbitrary>, #tpu.dimension_semantics<arbitrary>], iteration_bounds = array<i64: 2, 1, 1>, scalar_prefetch = 0 : i64, scratch_operands = 0 : i64, tpu.core_type = #tpu.core_type<tc>, window_params = [{transform_indices = @transform_0, window_bounds = array<i64: 1, 18, 18, 128>}, {transform_indices = @transform_1, window_bounds = array<i64: 3, 384, 128>}, {transform_indices = @transform_2, window_bounds = array<i64: 1, 128>}, {transform_indices = @transform_3, window_bounds = array<i64: 1, 256, 128>}]} {
    %c16_i32 = arith.constant 16 : i32
    %0 = arith.muli %arg2, %c16_i32 : i32
    %1 = tpu.assume_multiple %0, 16 : i32
    %c0_i32 = arith.constant 0 : i32
    %2 = arith.addi %1, %c0_i32 : i32
    %c0 = arith.constant 0 : index
    %3 = arith.index_cast %2 : i32 to index
    %c0_0 = arith.constant 0 : index
    %c0_1 = arith.constant 0 : index
    %4 = vector.load %arg3[%c0, %3, %c0_0, %c0_1] : memref<1x18x18x128xf32, #tpu.memory_space<vmem>>, vector<1x16x16x128xf32>
    %5 = vector.shape_cast %4 : vector<1x16x16x128xf32> to vector<16x16x128xf32>
    %6 = vector.shape_cast %5 : vector<16x16x128xf32> to vector<256x128xf32>
    %c0_i32_2 = arith.constant 0 : i32
    %7 = arith.addi %1, %c0_i32_2 : i32
    %c0_3 = arith.constant 0 : index
    %8 = arith.index_cast %7 : i32 to index
    %c1 = arith.constant 1 : index
    %c0_4 = arith.constant 0 : index
    %9 = vector.load %arg3[%c0_3, %8, %c1, %c0_4] : memref<1x18x18x128xf32, #tpu.memory_space<vmem>>, vector<1x16x16x128xf32>
    %10 = vector.shape_cast %9 : vector<1x16x16x128xf32> to vector<16x16x128xf32>
    %11 = vector.shape_cast %10 : vector<16x16x128xf32> to vector<256x128xf32>
    %c0_i32_5 = arith.constant 0 : i32
    %12 = arith.addi %1, %c0_i32_5 : i32
    %c0_6 = arith.constant 0 : index
    %13 = arith.index_cast %12 : i32 to index
    %c2 = arith.constant 2 : index
    %c0_7 = arith.constant 0 : index
    %14 = vector.load %arg3[%c0_6, %13, %c2, %c0_7] : memref<1x18x18x128xf32, #tpu.memory_space<vmem>>, vector<1x16x16x128xf32>
    %15 = vector.shape_cast %14 : vector<1x16x16x128xf32> to vector<16x16x128xf32>
    %16 = vector.shape_cast %15 : vector<16x16x128xf32> to vector<256x128xf32>
    %17 = tpu.concatenate %6, %11, %16 in 1 : vector<256x128xf32>, vector<256x128xf32>, vector<256x128xf32> -> vector<256x384xf32>
    %c0_8 = arith.constant 0 : index
    %c0_9 = arith.constant 0 : index
    %c0_10 = arith.constant 0 : index
    %18 = vector.load %arg4[%c0_8, %c0_9, %c0_10] : memref<3x384x128xf32, #tpu.memory_space<vmem>>, vector<1x384x128xf32>
    %19 = vector.shape_cast %18 : vector<1x384x128xf32> to vector<384x128xf32>
    %cst = arith.constant dense<0.000000e+00> : vector<256x128xf32>
    %20 = tpu.matmul %17, %19, %cst {dimension_numbers = #tpu.dot_dimension_numbers<[1], [0], [0], [1], [0, 0, 1, 1], [], []>} : vector<256x384xf32>, vector<384x128xf32>, vector<256x128xf32> -> vector<256x128xf32>
    %c1_i32 = arith.constant 1 : i32
    %21 = arith.addi %1, %c1_i32 : i32
    %c0_11 = arith.constant 0 : index
    %22 = arith.index_cast %21 : i32 to index
    %c0_12 = arith.constant 0 : index
    %c0_13 = arith.constant 0 : index
    %23 = vector.load %arg3[%c0_11, %22, %c0_12, %c0_13] : memref<1x18x18x128xf32, #tpu.memory_space<vmem>>, vector<1x16x16x128xf32>
    %24 = vector.shape_cast %23 : vector<1x16x16x128xf32> to vector<16x16x128xf32>
    %25 = vector.shape_cast %24 : vector<16x16x128xf32> to vector<256x128xf32>
    %c1_i32_14 = arith.constant 1 : i32
    %26 = arith.addi %1, %c1_i32_14 : i32
    %c0_15 = arith.constant 0 : index
    %27 = arith.index_cast %26 : i32 to index
    %c1_16 = arith.constant 1 : index
    %c0_17 = arith.constant 0 : index
    %28 = vector.load %arg3[%c0_15, %27, %c1_16, %c0_17] : memref<1x18x18x128xf32, #tpu.memory_space<vmem>>, vector<1x16x16x128xf32>
    %29 = vector.shape_cast %28 : vector<1x16x16x128xf32> to vector<16x16x128xf32>
    %30 = vector.shape_cast %29 : vector<16x16x128xf32> to vector<256x128xf32>
    %c1_i32_18 = arith.constant 1 : i32
    %31 = arith.addi %1, %c1_i32_18 : i32
    %c0_19 = arith.constant 0 : index
    %32 = arith.index_cast %31 : i32 to index
    %c2_20 = arith.constant 2 : index
    %c0_21 = arith.constant 0 : index
    %33 = vector.load %arg3[%c0_19, %32, %c2_20, %c0_21] : memref<1x18x18x128xf32, #tpu.memory_space<vmem>>, vector<1x16x16x128xf32>
    %34 = vector.shape_cast %33 : vector<1x16x16x128xf32> to vector<16x16x128xf32>
    %35 = vector.shape_cast %34 : vector<16x16x128xf32> to vector<256x128xf32>
    %36 = tpu.concatenate %25, %30, %35 in 1 : vector<256x128xf32>, vector<256x128xf32>, vector<256x128xf32> -> vector<256x384xf32>
    %c1_22 = arith.constant 1 : index
    %c0_23 = arith.constant 0 : index
    %c0_24 = arith.constant 0 : index
    %37 = vector.load %arg4[%c1_22, %c0_23, %c0_24] : memref<3x384x128xf32, #tpu.memory_space<vmem>>, vector<1x384x128xf32>
    %38 = vector.shape_cast %37 : vector<1x384x128xf32> to vector<384x128xf32>
    %cst_25 = arith.constant dense<0.000000e+00> : vector<256x128xf32>
    %39 = tpu.matmul %36, %38, %cst_25 {dimension_numbers = #tpu.dot_dimension_numbers<[1], [0], [0], [1], [0, 0, 1, 1], [], []>} : vector<256x384xf32>, vector<384x128xf32>, vector<256x128xf32> -> vector<256x128xf32>
    %40 = arith.addf %20, %39 : vector<256x128xf32>
    %c2_i32 = arith.constant 2 : i32
    %41 = arith.addi %1, %c2_i32 : i32
    %c0_26 = arith.constant 0 : index
    %42 = arith.index_cast %41 : i32 to index
    %c0_27 = arith.constant 0 : index
    %c0_28 = arith.constant 0 : index
    %43 = vector.load %arg3[%c0_26, %42, %c0_27, %c0_28] : memref<1x18x18x128xf32, #tpu.memory_space<vmem>>, vector<1x16x16x128xf32>
    %44 = vector.shape_cast %43 : vector<1x16x16x128xf32> to vector<16x16x128xf32>
    %45 = vector.shape_cast %44 : vector<16x16x128xf32> to vector<256x128xf32>
    %c2_i32_29 = arith.constant 2 : i32
    %46 = arith.addi %1, %c2_i32_29 : i32
    %c0_30 = arith.constant 0 : index
    %47 = arith.index_cast %46 : i32 to index
    %c1_31 = arith.constant 1 : index
    %c0_32 = arith.constant 0 : index
    %48 = vector.load %arg3[%c0_30, %47, %c1_31, %c0_32] : memref<1x18x18x128xf32, #tpu.memory_space<vmem>>, vector<1x16x16x128xf32>
    %49 = vector.shape_cast %48 : vector<1x16x16x128xf32> to vector<16x16x128xf32>
    %50 = vector.shape_cast %49 : vector<16x16x128xf32> to vector<256x128xf32>
    %c2_i32_33 = arith.constant 2 : i32
    %51 = arith.addi %1, %c2_i32_33 : i32
    %c0_34 = arith.constant 0 : index
    %52 = arith.index_cast %51 : i32 to index
    %c2_35 = arith.constant 2 : index
    %c0_36 = arith.constant 0 : index
    %53 = vector.load %arg3[%c0_34, %52, %c2_35, %c0_36] : memref<1x18x18x128xf32, #tpu.memory_space<vmem>>, vector<1x16x16x128xf32>
    %54 = vector.shape_cast %53 : vector<1x16x16x128xf32> to vector<16x16x128xf32>
    %55 = vector.shape_cast %54 : vector<16x16x128xf32> to vector<256x128xf32>
    %56 = tpu.concatenate %45, %50, %55 in 1 : vector<256x128xf32>, vector<256x128xf32>, vector<256x128xf32> -> vector<256x384xf32>
    %c2_37 = arith.constant 2 : index
    %c0_38 = arith.constant 0 : index
    %c0_39 = arith.constant 0 : index
    %57 = vector.load %arg4[%c2_37, %c0_38, %c0_39] : memref<3x384x128xf32, #tpu.memory_space<vmem>>, vector<1x384x128xf32>
    %58 = vector.shape_cast %57 : vector<1x384x128xf32> to vector<384x128xf32>
    %cst_40 = arith.constant dense<0.000000e+00> : vector<256x128xf32>
    %59 = tpu.matmul %56, %58, %cst_40 {dimension_numbers = #tpu.dot_dimension_numbers<[1], [0], [0], [1], [0, 0, 1, 1], [], []>} : vector<256x384xf32>, vector<384x128xf32>, vector<256x128xf32> -> vector<256x128xf32>
    %60 = arith.addf %40, %59 : vector<256x128xf32>
    %c0_41 = arith.constant 0 : index
    %c0_42 = arith.constant 0 : index
    %61 = vector.load %arg5[%c0_41, %c0_42] : memref<1x128xf32, #tpu.memory_space<vmem>>, vector<1x128xf32>
    %62 = vector.broadcast %61 : vector<1x128xf32> to vector<256x128xf32>
    %63 = arith.addf %60, %62 : vector<256x128xf32>
    %cst_43 = arith.constant 0.000000e+00 : f32
    %64 = vector.broadcast %cst_43 : f32 to vector<256x128xf32>
    %65 = arith.maximumf %63, %64 : vector<256x128xf32>
    %c0_44 = arith.constant 0 : index
    %c0_45 = arith.constant 0 : index
    %c0_46 = arith.constant 0 : index
    %66 = vector.load %arg6[%c0_44, %c0_45, %c0_46] : memref<1x256x128xf32, #tpu.memory_space<vmem>>, vector<1x256x128xf32>
    %67 = vector.shape_cast %66 : vector<1x256x128xf32> to vector<256x128xf32>
    %68 = vector.shape_cast %65 : vector<256x128xf32> to vector<1x256x128xf32>
    tpu.vector_store %arg6[%c0_44, %c0_45, %c0_46], %68 {strides = array<i32>} : memref<1x256x128xf32, #tpu.memory_space<vmem>>, vector<1x256x128xf32>,
    return
  }
  func.func @transform_0(%arg0: i32, %arg1: i32, %arg2: i32) -> (i32, i32, i32, i32) {
    %c0_i32 = arith.constant 0 : i32
    %c0_i32_0 = arith.constant 0 : i32
    %c0_i32_1 = arith.constant 0 : i32
    %c0_i32_2 = arith.constant 0 : i32
    return %arg0, %c0_i32, %c0_i32_0, %c0_i32_1 : i32, i32, i32, i32
  }
  func.func @transform_1(%arg0: i32, %arg1: i32, %arg2: i32) -> (i32, i32, i32) {
    %c0_i32 = arith.constant 0 : i32
    %c0_i32_0 = arith.constant 0 : i32
    %c0_i32_1 = arith.constant 0 : i32
    return %c0_i32, %c0_i32_0, %arg1 : i32, i32, i32
  }
  func.func @transform_2(%arg0: i32, %arg1: i32, %arg2: i32) -> (i32, i32) {
    %c0_i32 = arith.constant 0 : i32
    %c0_i32_0 = arith.constant 0 : i32
    return %c0_i32, %arg1 : i32, i32
  }
  func.func @transform_3(%arg0: i32, %arg1: i32, %arg2: i32) -> (i32, i32, i32) {
    %c0_i32 = arith.constant 0 : i32
    return %arg0, %arg2, %arg1 : i32, i32, i32
  }
}

</mosaic_0001>

<bundles_post_ra>
// kernel: tpu_custom_call.1
= control target key start
LH: loop header
LB: loop body
LE: loop exit
PB: predicated region body
PF: predicated region fallthrough
CT: control target
= control target key end

     0   :  { %8 = vsyncpa [#allocation3], 0  ;;  %s3632_s0 = inlined_call_operand.vmem [shape: f32[2,18,18,128], index: 0, kind: input, shape index: {}]   ;;  %s3633_s1 = inlined_call_operand.vmem [shape: f32[3,384,128], index: 1, kind: input, shape index: {}]   ;;  %s3634_s2 = inlined_call_operand.vmem [shape: f32[1,128], index: 2, kind: input, shape index: {}]   ;;  %s3635_s3 = inlined_call_operand.hbm [shape: f32[2,256,128], index: 3, kind: output, shape index: {}]  }
   0x1   :  { %10 = vsyncpa [#allocation3 + $0x1], 0  ;;  %s2461_s12 = smov 0   ;;  %s2463_s13 = smov 0  }
   0x2   :  { %s2465_s14 = smov 0   ;;  %s2467_s15 = smov 0  }
   0x3   :  { %s2469_s16 = smov 0   ;;  %s2471_s17 = smov 0  }
   0x4 LB: > { %s1949_s18 = sadd.s32 4294967295, %s2437_s17   ;;  %s1950_s19 = sadd.s32 4294967294, %s2437_s17   ;;  %s2437_s17 = sphi %s2471_s17, %s16_s17   ;;  %s2433_s16 = sphi %s2469_s16, %s3642_s16   ;;  %s2429_s15 = sphi %s2467_s15, %s3641_s15   ;;  %s2425_s14 = sphi %s2465_s14, %s3640_s14   ;;  %s2421_s13 = sphi %s2463_s13, %s3639_s13   ;;  %s2417_s12 = sphi %s2461_s12, %s3638_s12  }
   0x5   : > { %s35_s20 = sadd.s32 1, %s2433_s16  ;;  %s124_s21 = sadd.s32 1, %s2425_s14 }
   0x6   : > { %p37_p0 = scmp.ge.s32.totalorder %s35_s20, 2  ;;  %p134_p1 = scmp.ne.s32.totalorder %s2425_s14, %s2421_s13 }
   0x7   : > { %p135_p2 = scmp.eq.s32.totalorder %s1949_s18, 1  ;;  %p140_p3 = scmp.ne.s32.totalorder %s2421_s13, %s2417_s12 }
   0x8   : > { %s3644_s20 = smov (%p37_p0, %s35_s20), 0  ;;  %p141_p5 = scmp.eq.s32.totalorder %s1950_s19, 1 }
   0x9   : > { %p2501_p4 = por %p135_p2, %p134_p1  ;;  %s117_s23 = ssub.s32 %s2433_s16, %s3644_s20 }
   0xa   : > { %p1955_p6 = scmp.ge.s32.totalorder %s2437_s17, 1  ;;  %p122_p7 = scmp.eq.s32.totalorder %s117_s23, 0 }
   0xb   : > { %p2508_p8 = por %p141_p5, %p140_p3  ;;  %p180_p9 = scmp.lt.s32.totalorder %s2437_s17, 3 }
   0xc   : > { %s2514_s25 = scalar_select %p122_p7, %s2425_s14, %s124_s21  }
   0xd   : > { %p181_p10 = pnand %p1955_p6, %p180_p9 }
   0xe   : > { %p211_p11 = scmp.lt.s32.totalorder (!%p181_p10), %s2429_s15, 1  ;;  %s208_s29 = sand.u32 (!%p181_p10), 1, %s2421_s13  }
   0xf   : > { %184 = sbr.rel (%p181_p10) target bundleno = 767 (0x2ff), region = 32  ;;  %s1956_s5 = sshll.u32 (!%p181_p10), %s208_s29, 8 }
  0x10   : > { %s3415_s6 = scalar_lea.vmem (!%p181_p10), [#allocation2], %s1956_s5  ;;  %s2379_s27 = scalar_lea.hbm (!%p181_p10), %s3635_s3, 512 }
  0x11   : > { %s1832_s10 = sshll.u32 (!%p181_p10), %s3415_s6, 4  ;;  %s1833_s10 = int_to_ptr.vmem [resolvable:$true] %s1832_s10 }
  0x14   : > { %v2069_v0 = vld [vmem:[%s3633_s1 + $0x1f8] sm:$0xff]  ;;  %v2068_v1 = vld [vmem:[%s3633_s1 + $0x1f0] sm:$0xff]  ;;  %v2067_v2 = vld [vmem:[%s3633_s1 + $0x1e8] sm:$0xff]  ;;  %s212_s4 = scalar_select %p211_p11, %s2429_s15, 1 }
  0x15   : > { %2252 = vmatpush.msra.mxu1 %v2069_v0  ;;  %2253 = vmatpush.msra.mxu2 %v2069_v0  ;;  %v2066_v3 = vld [vmem:[%s3633_s1 + $0x1e0] sm:$0xff]  ;;  %v2065_v4 = vld [vmem:[%s3633_s1 + $0x1d8] sm:$0xff]  ;;  %v2064_v5 = vld [vmem:[%s3633_s1 + $0x1d0] sm:$0xff] }
  0x16   : > { %2254 = vmatpush.msra.mxu3 %v2069_v0  ;;  %519 = vmatpush.msra.mxu0 %v2069_v0  ;;  %v2063_v6 = vld [vmem:[%s3633_s1 + $0x1c8] sm:$0xff]  ;;  %v2062_v7 = vld [vmem:[%s3633_s1 + $0x1c0] sm:$0xff]  ;;  %v2061_v8 = vld [vmem:[%s3633_s1 + $0x1b8] sm:$0xff]  ;;  %s2300_s9 = smul.u32 432, %s212_s4 }
  0x17   : > { %2255 = vmatpush.msra.mxu1 %v2068_v1  ;;  %2256 = vmatpush.msra.mxu2 %v2068_v1  ;;  %v2060_v9 = vld [vmem:[%s3633_s1 + $0x1b0] sm:$0xff]  ;;  %v2059_v10 = vld [vmem:[%s3633_s1 + $0x1a8] sm:$0xff]  ;;  %v2058_v11 = vld [vmem:[%s3633_s1 + $0x1a0] sm:$0xff] }
  0x18   : > { %2257 = vmatpush.msra.mxu3 %v2068_v1  ;;  %520 = vmatpush.msra.mxu0 %v2068_v1  ;;  %v2057_v12 = vld [vmem:[%s3633_s1 + $0x198] sm:$0xff]  ;;  %v2056_v13 = vld [vmem:[%s3633_s1 + $0x190] sm:$0xff]  ;;  %v2055_v14 = vld [vmem:[%s3633_s1 + $0x188] sm:$0xff]  ;;  %s2566_s26 = scalar_lea.vmem %s3632_s0, %s2300_s9 }
  0x19   : > { %2258 = vmatpush.msra.mxu1 %v2067_v2  ;;  %2259 = vmatpush.msra.mxu2 %v2067_v2  ;;  %v2054_v15 = vld [vmem:[%s3633_s1 + $0x180] sm:$0xff]  ;;  %v2572_v16 = vld [vmem:[%s2566_s26 + $0x78] sm:$0xff]  ;;  %v2100_v22 = vld [vmem:[%s3633_s1 + $0x2f0] sm:$0xff] }
  0x1a   : > { %2260 = vmatpush.msra.mxu3 %v2067_v2  ;;  %521 = vmatpush.msra.mxu0 %v2067_v2  ;;  %v2575_v17 = vld [vmem:[%s2566_s26 + $0xd8] sm:$0xff]  ;;  %v337_v23 = vld [vmem:[%s3633_s1 + $0x70] sm:$0xff]  ;;  %v2099_v26 = vld [vmem:[%s3633_s1 + $0x2e8] sm:$0xff] }
  0x1b   : > { %2261 = vmatpush.msra.mxu1 %v2066_v3  ;;  %2262 = vmatpush.msra.mxu2 %v2066_v3  ;;  %v1982_v18 = vld [vmem:[%s2566_s26 + $0x138] sm:$0xff]  ;;  %v2084_v25 = vld [vmem:[%s3633_s1 + $0x270] sm:$0xff]  ;;  %v336_v27 = vld [vmem:[%s3633_s1 + $0x68] sm:$0xff] }
  0x1c   : > { %2263 = vmatpush.msra.mxu3 %v2066_v3  ;;  %522 = vmatpush.msra.mxu0 %v2066_v3  ;;  %v2101_v19 = vld [vmem:[%s3633_s1 + $0x2f8] sm:$0xff]  ;;  %v2083_v29 = vld [vmem:[%s3633_s1 + $0x268] sm:$0xff]  ;;  %v2615_v30 = vld [vmem:[%s2566_s26 + $0x80] sm:$0xff] }
  0x1d   : > { %2264 = vmatpush.msra.mxu1 %v2065_v4  ;;  %2265 = vmatpush.msra.mxu2 %v2065_v4  ;;  %v338_v20 = vld [vmem:[%s3633_s1 + $0x78] sm:$0xff]  ;;  %v2098_v31 = vld [vmem:[%s3633_s1 + $0x2e0] sm:$0xff]  ;;  %v353_v35 = vld [vmem:[%s3633_s1 + $0xf0] sm:$0xff] }
  0x1e   : > { %2266 = vmatpush.msra.mxu3 %v2065_v4  ;;  %523 = vmatpush.msra.mxu0 %v2065_v4  ;;  %v2085_v21 = vld [vmem:[%s3633_s1 + $0x278] sm:$0xff]  ;;  %v2621_v32 = vld [vmem:[%s2566_s26 + $0xe0] sm:$0xff]  ;;  %v352_v39 = vld [vmem:[%s3633_s1 + $0xe8] sm:$0xff] }
  0x1f   : > { %2267 = vmatpush.msra.mxu1 %v2064_v5  ;;  %2268 = vmatpush.msra.mxu2 %v2064_v5  ;;  %v2596_v24 = vld [vmem:[%s2566_s26 + $0x18] sm:$0xff]  ;;  %v1983_v33 = vld [vmem:[%s2566_s26 + $0x140] sm:$0xff]  ;;  %v2096_v41 = vld [vmem:[%s3633_s1 + $0x2d0] sm:$0xff] }
  0x20   : > { %2269 = vmatpush.msra.mxu3 %v2064_v5  ;;  %524 = vmatpush.msra.mxu0 %v2064_v5  ;;  %v354_v28 = vld [vmem:[%s3633_s1 + $0xf8] sm:$0xff]  ;;  %v335_v34 = vld [vmem:[%s3633_s1 + $0x60] sm:$0xff]  ;;  %v333_v42 = vld [vmem:[%s3633_s1 + $0x50] sm:$0xff] }
  0x21   : > { %2270 = vmatpush.msra.mxu1 %v2063_v6  ;;  %2271 = vmatpush.msra.mxu2 %v2063_v6  ;;  %v2097_v36 = vld [vmem:[%s3633_s1 + $0x2d8] sm:$0xff]  ;;  %v2082_v37 = vld [vmem:[%s3633_s1 + $0x260] sm:$0xff]  ;;  %v2095_v45 = vld [vmem:[%s3633_s1 + $0x2c8] sm:$0xff] }
  0x22   : > { %2272 = vmatpush.msra.mxu3 %v2063_v6  ;;  %525 = vmatpush.msra.mxu0 %v2063_v6  ;;  %v334_v38 = vld [vmem:[%s3633_s1 + $0x58] sm:$0xff]  ;;  %v2645_v40 = vld [vmem:[%s2566_s26 + $0x20] sm:$0xff]  ;;  %v2664_v46 = vld [vmem:[%s2566_s26 + $0x90] sm:$0xff] }
  0x23   : > { %2273 = vmatpush.msra.mxu1 %v2062_v7  ;;  %2274 = vmatpush.msra.mxu2 %v2062_v7  ;;  %v351_v43 = vld [vmem:[%s3633_s1 + $0xe0] sm:$0xff]  ;;  %v2081_v44 = vld [vmem:[%s3633_s1 + $0x258] sm:$0xff]  ;;  %v332_v47 = vld [vmem:[%s3633_s1 + $0x48] sm:$0xff] }
  0x24   : > { %2275 = vmatpush.msra.mxu3 %v2062_v7  ;;  %526 = vmatpush.msra.mxu0 %v2062_v7  ;;  %v2670_v48 = vld [vmem:[%s2566_s26 + $0xf0] sm:$0xff]  ;;  %v350_v50 = vld [vmem:[%s3633_s1 + $0xd8] sm:$0xff]  ;;  %v2094_v52 = vld [vmem:[%s3633_s1 + $0x2c0] sm:$0xff] }
  0x25   : > { %2276 = vmatpush.msra.mxu1 %v2061_v8  ;;  %2277 = vmatpush.msra.mxu2 %v2061_v8  ;;  %v1984_v49 = vld [vmem:[%s2566_s26 + $0x150] sm:$0xff]  ;;  %v331_v53 = vld [vmem:[%s3633_s1 + $0x40] sm:$0xff]  ;;  %v2079_v55 = vld [vmem:[%s3633_s1 + $0x248] sm:$0xff] }
  0x26   : > { %2278 = vmatpush.msra.mxu3 %v2061_v8  ;;  %527 = vmatpush.msra.mxu0 %v2061_v8  ;;  %v2080_v51 = vld [vmem:[%s3633_s1 + $0x250] sm:$0xff]  ;;  %v2093_v57 = vld [vmem:[%s3633_s1 + $0x2b8] sm:$0xff]  ;;  %v348_v59 = vld [vmem:[%s3633_s1 + $0xc8] sm:$0xff] }
  0x27   : > { %2279 = vmatpush.msra.mxu1 %v2060_v9  ;;  %2280 = vmatpush.msra.mxu2 %v2060_v9  ;;  %v349_v54 = vld [vmem:[%s3633_s1 + $0xd0] sm:$0xff]  ;;  %v330_v58 = vld [vmem:[%s3633_s1 + $0x38] sm:$0xff]  ;;  %v2078_v60 = vld [vmem:[%s3633_s1 + $0x240] sm:$0xff] }
  0x28   : > { %2281 = vmatpush.msra.mxu3 %v2060_v9  ;;  %528 = vmatpush.msra.mxu0 %v2060_v9  ;;  %v2694_v56 = vld [vmem:[%s2566_s26 + $0x30] sm:$0xff]  ;;  %v2713_v62 = vld [vmem:[%s2566_s26 + $0x98] sm:$0xff]  ;;  %v347_v2 = vld [vmem:[%s3633_s1 + $0xc0] sm:$0xff] }
  0x29   : > { %2282 = vmatpush.msra.mxu1 %v2059_v10  ;;  %2283 = vmatpush.msra.mxu2 %v2059_v10  ;;  %v2092_v61 = vld [vmem:[%s3633_s1 + $0x2b0] sm:$0xff]  ;;  %v2719_v0 = vld [vmem:[%s2566_s26 + $0xf8] sm:$0xff]  ;;  %v2091_v4 = vld [vmem:[%s3633_s1 + $0x2a8] sm:$0xff] }
  0x2a   : > { %2284 = vmatpush.msra.mxu3 %v2059_v10  ;;  %529 = vmatpush.msra.mxu0 %v2059_v10  ;;  %v329_v63 = vld [vmem:[%s3633_s1 + $0x30] sm:$0xff]  ;;  %v1985_v1 = vld [vmem:[%s2566_s26 + $0x158] sm:$0xff]  ;;  %v328_v5 = vld [vmem:[%s3633_s1 + $0x28] sm:$0xff] }
  0x2b   : > { %2285 = vmatpush.msra.mxu1 %v2058_v11  ;;  %2286 = vmatpush.msra.mxu2 %v2058_v11  ;;  %v2077_v3 = vld [vmem:[%s3633_s1 + $0x238] sm:$0xff]  ;;  %v2076_v7 = vld [vmem:[%s3633_s1 + $0x230] sm:$0xff]  ;;  %v2090_v9 = vld [vmem:[%s3633_s1 + $0x2a0] sm:$0xff] }
  0x2c   : > { %2287 = vmatpush.msra.mxu3 %v2058_v11  ;;  %530 = vmatpush.msra.mxu0 %v2058_v11  ;;  %v346_v6 = vld [vmem:[%s3633_s1 + $0xb8] sm:$0xff]  ;;  %v327_v10 = vld [vmem:[%s3633_s1 + $0x20] sm:$0xff]  ;;  %v345_v11 = vld [vmem:[%s3633_s1 + $0xb0] sm:$0xff] }
  0x2d   : > { %2288 = vmatpush.msra.mxu1 %v2057_v12  ;;  %2289 = vmatpush.msra.mxu2 %v2057_v12  ;;  %v2743_v8 = vld [vmem:[%s2566_s26 + $0x38] sm:$0xff] }
  0x2e   : > { %2290 = vmatpush.msra.mxu3 %v2057_v12  ;;  %531 = vmatpush.msra.mxu0 %v2057_v12  ;;  %v2075_v12 = vld [vmem:[%s3633_s1 + $0x228] sm:$0xff] }
  0x2f   : > { %2291 = vmatpush.msra.mxu1 %v2056_v13  ;;  %2292 = vmatpush.msra.mxu2 %v2056_v13 }
  0x30   : > { %2293 = vmatpush.msra.mxu3 %v2056_v13  ;;  %532 = vmatpush.msra.mxu0 %v2056_v13  ;;  %v2089_v13 = vld [vmem:[%s3633_s1 + $0x298] sm:$0xff] }
  0x31   : > { %2294 = vmatpush.msra.mxu1 %v2055_v14  ;;  %2295 = vmatpush.msra.mxu2 %v2055_v14 }
  0x32   : > { %2296 = vmatpush.msra.mxu3 %v2055_v14  ;;  %533 = vmatpush.msra.mxu0 %v2055_v14  ;;  %v2762_v14 = vld [vmem:[%s2566_s26 + $0xa8] sm:$0xff] }
  0x33   : > { %2297 = vmatpush.msra.mxu1 %v2054_v15  ;;  %2298 = vmatpush.msra.mxu2 %v2054_v15 }
  0x34   : > { %2299 = vmatpush.msra.mxu3 %v2054_v15  ;;  %559 = vmatmul.f32.vlgmr.msra.gmra.mxu1 %v2572_v16 }
  0x35   : > { %583 = vmatmul.f32.vlgmr.msra.gmra.mxu2 %v2575_v17  ;;  %607 = vmatmul.f32.vlgmr.msra.gmra.mxu3 %v1982_v18  ;;  %v2768_v18 = vld [vmem:[%s2566_s26 + $0x108] sm:$0xff] }
  0x36   : > { %745 = vmatpush.msrb.mxu2 %v2101_v19  ;;  %858 = vmatpush.msrb.mxu3 %v338_v20  ;;  %v1986_v19 = vld [vmem:[%s2566_s26 + $0x168] sm:$0xff] }
  0x37   : > { %534 = vmatpush.msra.mxu0 %v2054_v15  ;;  %632 = vmatpush.msrb.mxu1 %v2085_v21  ;;  %v326_v15 = vld [vmem:[%s3633_s1 + $0x18] sm:$0xff]  ;;  %v344_v20 = vld [vmem:[%s3633_s1 + $0xa8] sm:$0xff]  ;;  %v2074_v21 = vld [vmem:[%s3633_s1 + $0x220] sm:$0xff] }
  0x38   : > { %746 = vmatpush.msrb.mxu2 %v2100_v22  ;;  %859 = vmatpush.msrb.mxu3 %v337_v23  ;;  %v2088_v22 = vld [vmem:[%s3633_s1 + $0x290] sm:$0xff] }
  0x39   : > { %535 = vmatmul.f32.vlgmr.msra.gmra.mxu0 %v2596_v24  ;;  %633 = vmatpush.msrb.mxu1 %v2084_v25  ;;  %v325_v23 = vld [vmem:[%s3633_s1 + $0x10] sm:$0xff]  ;;  %v343_v25 = vld [vmem:[%s3633_s1 + $0xa0] sm:$0xff] }
  0x3a   : > { %747 = vmatpush.msrb.mxu2 %v2099_v26  ;;  %860 = vmatpush.msrb.mxu3 %v336_v27  ;;  %v2073_v26 = vld [vmem:[%s3633_s1 + $0x218] sm:$0xff]  ;;  %v2792_v27 = vld [vmem:[%s2566_s26 + $0x48] sm:$0xff] }
  0x3b   : > { %971 = vmatpush.msrb.mxu0 %v354_v28  ;;  %634 = vmatpush.msrb.mxu1 %v2083_v29  ;;  %v2087_v28 = vld [vmem:[%s3633_s1 + $0x288] sm:$0xff] }
  0x3c   : > { %562 = vmatmul.f32.gmra.mxu1 %v2615_v30  ;;  %748 = vmatpush.msrb.mxu2 %v2098_v31  ;;  %v324_v29 = vld [vmem:[%s3633_s1 + $0x8] sm:$0xff]  ;;  %v342_v31 = vld [vmem:[%s3633_s1 + $0x98] sm:$0xff] }
  0x3d   : > { %586 = vmatmul.f32.gmra.mxu2 %v2621_v32  ;;  %610 = vmatmul.f32.gmra.mxu3 %v1983_v33  ;;  %v2072_v33 = vld [vmem:[%s3633_s1 + $0x210] sm:$0xff] }
  0x3e   : > { %861 = vmatpush.msrb.mxu3 %v335_v34  ;;  %972 = vmatpush.msrb.mxu0 %v353_v35  ;;  %v2086_v34 = vld [vmem:[%s3633_s1 + $0x280] sm:$0xff]  ;;  %v2811_v35 = vld [vmem:[%s2566_s26 + $0xb0] sm:$0xff] }
  0x3f   : > { %749 = vmatpush.msrb.mxu2 %v2097_v36  ;;  %635 = vmatpush.msrb.mxu1 %v2082_v37  ;;  %v323_v36 = vld [vmem:[%s3633_s1] sm:$0xff]  ;;  %v2817_v37 = vld [vmem:[%s2566_s26 + $0x110] sm:$0xff] }
  0x40   : > { %862 = vmatpush.msrb.mxu3 %v334_v38  ;;  %973 = vmatpush.msrb.mxu0 %v352_v39  ;;  %v1987_v38 = vld [vmem:[%s2566_s26 + $0x170] sm:$0xff] }
  0x41   : > { %538 = vmatmul.f32.gmra.mxu0 %v2645_v40  ;;  %750 = vmatpush.msrb.mxu2 %v2096_v41  ;;  %v341_v39 = vld [vmem:[%s3633_s1 + $0x90] sm:$0xff]  ;;  %v2071_v41 = vld [vmem:[%s3633_s1 + $0x208] sm:$0xff] }
  0x42   : > { %863 = vmatpush.msrb.mxu3 %v333_v42  ;;  %974 = vmatpush.msrb.mxu0 %v351_v43  ;;  %v2213_v42 = vld [vmem:[%s3633_s1 + $0x378] sm:$0xff] }
  0x43   : > { %636 = vmatpush.msrb.mxu1 %v2081_v44  ;;  %751 = vmatpush.msrb.mxu2 %v2095_v45  ;;  %v2229_v43 = vld [vmem:[%s3633_s1 + $0x3f8] sm:$0xff]  ;;  %v2070_v44 = vld [vmem:[%s3633_s1 + $0x200] sm:$0xff]  ;;  %v340_v45 = vld [vmem:[%s3633_s1 + $0x88] sm:$0xff] }
  0x44   : > { %565 = vmatmul.f32.gmra.mxu1 %v2664_v46  ;;  %864 = vmatpush.msrb.mxu3 %v332_v47  ;;  %v2841_v47 = vld [vmem:[%s2566_s26 + $0x50] sm:$0xff] }
  0x45   : > { %589 = vmatmul.f32.gmra.mxu2 %v2670_v48  ;;  %613 = vmatmul.f32.gmra.mxu3 %v1984_v49  ;;  %v370_v49 = vld [vmem:[%s3633_s1 + $0x178] sm:$0xff] }
  0x46   : > { %975 = vmatpush.msrb.mxu0 %v350_v50  ;;  %637 = vmatpush.msrb.mxu1 %v2080_v51  ;;  %v339_v50 = vld [vmem:[%s3633_s1 + $0x80] sm:$0xff]  ;;  %v2245_v51 = vld [vmem:[%s3633_s1 + $0x478] sm:$0xff] }
  0x47   : > { %752 = vmatpush.msrb.mxu2 %v2094_v52  ;;  %865 = vmatpush.msrb.mxu3 %v331_v53  ;;  %v2854_v52 = vld [vmem:[%s2566_s26 + $0xc0] sm:$0xff] }
  0x48   : > { %976 = vmatpush.msrb.mxu0 %v349_v54  ;;  %638 = vmatpush.msrb.mxu1 %v2079_v55  ;;  %v2857_v53 = vld [vmem:[%s2566_s26 + $0x120] sm:$0xff]  ;;  %v2212_v55 = vld [vmem:[%s3633_s1 + $0x370] sm:$0xff] }
  0x49   : > { %541 = vmatmul.f32.gmra.mxu0 %v2694_v56  ;;  %753 = vmatpush.msrb.mxu2 %v2093_v57  ;;  %v1988_v54 = vld [vmem:[%s2566_s26 + $0x180] sm:$0xff]  ;;  %v2228_v57 = vld [vmem:[%s3633_s1 + $0x3f0] sm:$0xff] }
  0x4a   : > { %866 = vmatpush.msrb.mxu3 %v330_v58  ;;  %977 = vmatpush.msrb.mxu0 %v348_v59  ;;  %v2869_v58 = vld [vmem:[%s2566_s26 + $0x60] sm:$0xff]  ;;  %v2873_v59 = vld [vmem:[%s2566_s26 + $0xc8] sm:$0xff] }
  0x4b   : > { %639 = vmatpush.msrb.mxu1 %v2078_v60  ;;  %754 = vmatpush.msrb.mxu2 %v2092_v61  ;;  %v2876_v60 = vld [vmem:[%s2566_s26 + $0x128] sm:$0xff] }
  0x4c   : > { %568 = vmatmul.f32.gmra.mxu1 %v2713_v62  ;;  %867 = vmatpush.msrb.mxu3 %v329_v63  ;;  %v1989_v61 = vld [vmem:[%s2566_s26 + $0x188] sm:$0xff]  ;;  %v369_v63 = vld [vmem:[%s3633_s1 + $0x170] sm:$0xff] }
  0x4d   : > { %592 = vmatmul.f32.gmra.mxu2 %v2719_v0  ;;  %616 = vmatmul.f32.gmra.mxu3 %v1985_v1  ;;  %v2244_v1 = vld [vmem:[%s3633_s1 + $0x470] sm:$0xff] }
  0x4e   : > { %978 = vmatpush.msrb.mxu0 %v347_v2  ;;  %640 = vmatpush.msrb.mxu1 %v2077_v3  ;;  %v2888_v2 = vld [vmem:[%s2566_s26 + $0x68] sm:$0xff]  ;;  %v1990_v3 = vld [vmem:[%s2566_s26 + $0x19] sm:$0xff] }
  0x4f   : > { %755 = vmatpush.msrb.mxu2 %v2091_v4  ;;  %868 = vmatpush.msrb.mxu3 %v328_v5  ;;  %v2022_v4 = vld [vmem:[%s2566_s26 + $0x1a] sm:$0xff] }
  0x50   : > { %979 = vmatpush.msrb.mxu0 %v346_v6  ;;  %641 = vmatpush.msrb.mxu1 %v2076_v7  ;;  %v227_v5 = vld [vmem:[%s2566_s26] sm:$0xff]  ;;  %v2211_v6 = vld [vmem:[%s3633_s1 + $0x368] sm:$0xff] }
  0x51   : > { %544 = vmatmul.f32.gmra.mxu0 %v2743_v8  ;;  %756 = vmatpush.msrb.mxu2 %v2090_v9  ;;  %v2227_v7 = vld [vmem:[%s3633_s1 + $0x3e8] sm:$0xff] }
  0x52   : > { %869 = vmatpush.msrb.mxu3 %v327_v10  ;;  %980 = vmatpush.msrb.mxu0 %v345_v11  ;;  %v259_v9 = vld [vmem:[%s2566_s26 + $0x1] sm:$0xff] }
  0x53   : > { %642 = vmatpush.msrb.mxu1 %v2075_v12  ;;  %757 = vmatpush.msrb.mxu2 %v2089_v13  ;;  %v1991_v10 = vld [vmem:[%s2566_s26 + $0x21] sm:$0xff] }
  0x54   : > { %571 = vmatmul.f32.gmra.mxu1 %v2762_v14  ;;  %870 = vmatpush.msrb.mxu3 %v326_v15  ;;  %v2023_v11 = vld [vmem:[%s2566_s26 + $0x22] sm:$0xff] }
  0x55   : > { %595 = vmatmul.f32.gmra.mxu2 %v2768_v18  ;;  %619 = vmatmul.f32.gmra.mxu3 %v1986_v19  ;;  %v228_v12 = vld [vmem:[%s2566_s26 + $0x8] sm:$0xff] }
  0x56   : > { %981 = vmatpush.msrb.mxu0 %v344_v20  ;;  %643 = vmatpush.msrb.mxu1 %v2074_v21  ;;  %v368_v13 = vld [vmem:[%s3633_s1 + $0x168] sm:$0xff]  ;;  %v1992_v20 = vld [vmem:[%s2566_s26 + $0x31] sm:$0xff] }
  0x57   : > { %758 = vmatpush.msrb.mxu2 %v2088_v22  ;;  %871 = vmatpush.msrb.mxu3 %v325_v23  ;;  %v2243_v15 = vld [vmem:[%s3633_s1 + $0x468] sm:$0xff]  ;;  %v2024_v21 = vld [vmem:[%s2566_s26 + $0x32] sm:$0xff]  ;;  %v2210_v22 = vld [vmem:[%s3633_s1 + $0x360] sm:$0xff] }
  0x58   : > { %982 = vmatpush.msrb.mxu0 %v343_v25  ;;  %644 = vmatpush.msrb.mxu1 %v2073_v26  ;;  %v260_v19 = vld [vmem:[%s2566_s26 + $0x9] sm:$0xff]  ;;  %v2226_v23 = vld [vmem:[%s3633_s1 + $0x3e0] sm:$0xff] }
  0x59   : > { %547 = vmatmul.f32.gmra.mxu0 %v2792_v27  ;;  %759 = vmatpush.msrb.mxu2 %v2087_v28  ;;  %v1993_v25 = vld [vmem:[%s2566_s26 + $0x39] sm:$0xff] }
  0x5a   : > { %872 = vmatpush.msrb.mxu3 %v324_v29  ;;  %983 = vmatpush.msrb.mxu0 %v342_v31  ;;  %v2025_v26 = vld [vmem:[%s2566_s26 + $0x3a] sm:$0xff]  ;;  %v1994_v29 = vld [vmem:[%s2566_s26 + $0x49] sm:$0xff] }
  0x5b   : > { %645 = vmatpush.msrb.mxu1 %v2072_v33  ;;  %760 = vmatpush.msrb.mxu2 %v2086_v34  ;;  %v2242_v28 = vld [vmem:[%s3633_s1 + $0x460] sm:$0xff]  ;;  %v2026_v31 = vld [vmem:[%s2566_s26 + $0x4a] sm:$0xff]  ;;  %v2225_v33 = vld [vmem:[%s3633_s1 + $0x3d8] sm:$0xff] }
  0x5c   : > { %574 = vmatmul.f32.gmra.mxu1 %v2811_v35  ;;  %873 = vmatpush.msrb.mxu3 %v323_v36  ;;  %v1995_v34 = vld [vmem:[%s2566_s26 + $0x51] sm:$0xff] }
  0x5d   : > { %598 = vmatmul.f32.gmra.mxu2 %v2817_v37  ;;  %622 = vmatmul.f32.gmra.mxu3 %v1987_v38  ;;  %v2027_v36 = vld [vmem:[%s2566_s26 + $0x52] sm:$0xff] }
  0x5e   : > { %984 = vmatpush.msrb.mxu0 %v341_v39  ;;  %646 = vmatpush.msrb.mxu1 %v2071_v41  ;;  %v2241_v38 = vld [vmem:[%s3633_s1 + $0x458] sm:$0xff]  ;;  %v1996_v39 = vld [vmem:[%s2566_s26 + $0x61] sm:$0xff] }
  0x5f   : > { %1345 = vmatpush.msra.mxu2 %v2213_v42  ;;  %1458 = vmatpush.msra.mxu3 %v2229_v43  ;;  %v2028_v41 = vld [vmem:[%s2566_s26 + $0x62] sm:$0xff]  ;;  %v2224_v42 = vld [vmem:[%s3633_s1 + $0x3d0] sm:$0xff] }
  0x60   : > { %647 = vmatpush.msrb.mxu1 %v2070_v44  ;;  %985 = vmatpush.msrb.mxu0 %v340_v45  ;;  %v1997_v43 = vld [vmem:[%s2566_s26 + $0x69] sm:$0xff] }
  0x61   : > { %550 = vmatmul.f32.gmra.mxu0 %v2841_v47  ;;  %1346 = vmatpush.msra.mxu2 %v2212_v55  ;;  %v2029_v44 = vld [vmem:[%s2566_s26 + $0x6a] sm:$0xff] }
  0x62   : > { %1084 = vmatpush.msra.mxu1 %v370_v49  ;;  %986 = vmatpush.msrb.mxu0 %v339_v50  ;;  %v2240_v45 = vld [vmem:[%s3633_s1 + $0x450] sm:$0xff]  ;;  %v1998_v50 = vld [vmem:[%s2566_s26 + $0x79] sm:$0xff] }
  0x63   : > { %1459 = vmatpush.msra.mxu3 %v2228_v57  ;;  %1347 = vmatpush.msra.mxu2 %v2211_v6 }
  0x64   : > { %1571 = vmatpush.msra.mxu0 %v2245_v51  ;;  %577 = vmatmul.f32.gmra.mxu1 %v2854_v52  ;;  %v2030_v51 = vld [vmem:[%s2566_s26 + $0x7a] sm:$0xff] }
  0x65   : > { %601 = vmatmul.f32.gmra.mxu2 %v2857_v53  ;;  %625 = vmatmul.f32.gmra.mxu3 %v1988_v54  ;;  %v2223_v54 = vld [vmem:[%s3633_s1 + $0x3c8] sm:$0xff] }
  0x66   : > { %1085 = vmatpush.msra.mxu1 %v369_v63  ;;  %1572 = vmatpush.msra.mxu0 %v2244_v1  ;;  %v2031_v1 = vld [vmem:[%s2566_s26 + $0x82] sm:$0xff] }
  0x67   : > { %1460 = vmatpush.msra.mxu3 %v2227_v7  ;;  %1348 = vmatpush.msra.mxu2 %v2210_v22  ;;  %v363_v22 = vld [vmem:[%s3633_s1 + $0x140] sm:$0xff] }
  0x68   : > { %1086 = vmatpush.msra.mxu1 %v368_v13  ;;  %1573 = vmatpush.msra.mxu0 %v2243_v15 }
  0x69   : > { %553 = vmatmul.f32.gmra.mxu0 %v2869_v58  ;;  %1461 = vmatpush.msra.mxu3 %v2226_v23  ;;  %v2238_v23 = vld [vmem:[%s3633_s1 + $0x440] sm:$0xff] }
  0x6a   : > { %1574 = vmatpush.msra.mxu0 %v2242_v28 }
  0x6b   : > { %1462 = vmatpush.msra.mxu3 %v2225_v33 }
  0x6c   : > { %580 = vmatmul.f32.gmra.mxu1 %v2873_v59  ;;  %1575 = vmatpush.msra.mxu0 %v2241_v38  ;;  %v2035_v38 = vld [vmem:[%s2566_s26 + $0xb2] sm:$0xff] }
  0x6d   : > { %604 = vmatmul.f32.gmra.mxu2 %v2876_v60  ;;  %628 = vmatmul.f32.gmra.mxu3 %v1989_v61 }
  0x6e   : > { %1463 = vmatpush.msra.mxu3 %v2224_v42  ;;  %1576 = vmatpush.msra.mxu0 %v2240_v45  ;;  %v2204_v45 = vld [vmem:[%s3633_s1 + $0x330] sm:$0xff] }
  0x70   : > { %1464 = vmatpush.msra.mxu3 %v2223_v54 }
  0x71   : > { %556 = vmatmul.f32.gmra.mxu0 %v2888_v2 }
  0x74   : > { %648 = vmatmul.f32.vlgmr.msrb.gmra.mxu1 %v1990_v3 }
  0x75   : > { %761 = vmatmul.f32.vlgmr.msrb.gmra.mxu2 %v2022_v4  ;;  %874 = vmatmul.f32.vlgmr.msrb.gmra.mxu3 %v227_v5  ;;  %v2239_v4 = vld [vmem:[%s3633_s1 + $0x448] sm:$0xff] }
  0x76   : > { %1577 = vmatpush.msra.mxu0 %v2239_v4  ;;  %v2236_v4 = vld [vmem:[%s3633_s1 + $0x430] sm:$0xff] }
  0x78   : > { %1578 = vmatpush.msra.mxu0 %v2238_v23 }
  0x79   : > { %987 = vmatmul.f32.vlgmr.msrb.gmra.mxu0 %v259_v9 }
  0x7c   : > { %651 = vmatmul.f32.gmra.mxu1 %v1991_v10 }
  0x7d   : > { %764 = vmatmul.f32.gmra.mxu2 %v2023_v11  ;;  %877 = vmatmul.f32.gmra.mxu3 %v228_v12  ;;  %v2206_v11 = vld [vmem:[%s3633_s1 + $0x340] sm:$0xff] }
  0x7e   : > { %v2222_v12 = vld [vmem:[%s3633_s1 + $0x3c0] sm:$0xff] }
  0x7f   : > { %1465 = vmatpush.msra.mxu3 %v2222_v12 }
  0x81   : > { %990 = vmatmul.f32.gmra.mxu0 %v260_v19 }
  0x84   : > { %654 = vmatmul.f32.gmra.mxu1 %v1992_v20 }
  0x85   : > { %767 = vmatmul.f32.gmra.mxu2 %v2024_v21  ;;  %880 = vmatmul.f32.gmra.mxu3 %v2596_v24  ;;  %v367_v24 = vld [vmem:[%s3633_s1 + $0x160] sm:$0xff] }
  0x86   : > { %1087 = vmatpush.msra.mxu1 %v367_v24  ;;  %v2033_v21 = vld [vmem:[%s2566_s26 + $0x9a] sm:$0xff] }
  0x89   : > { %993 = vmatmul.f32.gmra.mxu0 %v1990_v3  ;;  %v364_v3 = vld [vmem:[%s3633_s1 + $0x148] sm:$0xff] }
  0x8c   : > { %657 = vmatmul.f32.gmra.mxu1 %v1993_v25 }
  0x8d   : > { %770 = vmatmul.f32.gmra.mxu2 %v2025_v26  ;;  %883 = vmatmul.f32.gmra.mxu3 %v2645_v40  ;;  %v2209_v40 = vld [vmem:[%s3633_s1 + $0x358] sm:$0xff] }
  0x8e   : > { %1349 = vmatpush.msra.mxu2 %v2209_v40  ;;  %v2221_v40 = vld [vmem:[%s3633_s1 + $0x3b8] sm:$0xff] }
  0x8f   : > { %1466 = vmatpush.msra.mxu3 %v2221_v40 }
  0x91   : > { %996 = vmatmul.f32.gmra.mxu0 %v1991_v10  ;;  %v2032_v10 = vld [vmem:[%s2566_s26 + $0x92] sm:$0xff] }
  0x94   : > { %660 = vmatmul.f32.gmra.mxu1 %v1994_v29 }
  0x95   : > { %773 = vmatmul.f32.gmra.mxu2 %v2026_v31  ;;  %886 = vmatmul.f32.gmra.mxu3 %v2694_v56  ;;  %v366_v56 = vld [vmem:[%s3633_s1 + $0x158] sm:$0xff] }
  0x96   : > { %1088 = vmatpush.msra.mxu1 %v366_v56  ;;  %v2205_v31 = vld [vmem:[%s3633_s1 + $0x338] sm:$0xff] }
  0x99   : > { %999 = vmatmul.f32.gmra.mxu0 %v1992_v20 }
  0x9c   : > { %663 = vmatmul.f32.gmra.mxu1 %v1995_v34 }
  0x9d   : > { %776 = vmatmul.f32.gmra.mxu2 %v2027_v36  ;;  %889 = vmatmul.f32.gmra.mxu3 %v2743_v8  ;;  %v2208_v8 = vld [vmem:[%s3633_s1 + $0x350] sm:$0xff] }
  0x9e   : > { %1350 = vmatpush.msra.mxu2 %v2208_v8 }
  0xa1   : > { %1002 = vmatmul.f32.gmra.mxu0 %v1993_v25 }
  0xa4   : > { %666 = vmatmul.f32.gmra.mxu1 %v1996_v39 }
  0xa5   : > { %779 = vmatmul.f32.gmra.mxu2 %v2028_v41  ;;  %892 = vmatmul.f32.gmra.mxu3 %v2792_v27  ;;  %v365_v27 = vld [vmem:[%s3633_s1 + $0x150] sm:$0xff]  ;;  %v2237_v41 = vld [vmem:[%s3633_s1 + $0x438] sm:$0xff] }
  0xa6   : > { %1089 = vmatpush.msra.mxu1 %v365_v27  ;;  %1579 = vmatpush.msra.mxu0 %v2237_v41  ;;  %v2036_v27 = vld [vmem:[%s2566_s26 + $0xc2] sm:$0xff] }
  0xa8   : > { %1090 = vmatpush.msra.mxu1 %v364_v3  ;;  %v361_v3 = vld [vmem:[%s3633_s1 + $0x130] sm:$0xff]  ;;  %1580 = vmatpush.msra.mxu0 %v2236_v4 }
  0xa9   : > { %1005 = vmatmul.f32.gmra.mxu0 %v1994_v29  ;;  %v2034_v29 = vld [vmem:[%s2566_s26 + $0xaa] sm:$0xff] }
  0xaa   : > { %1091 = vmatpush.msra.mxu1 %v363_v22  ;;  %v2219_v22 = vld [vmem:[%s3633_s1 + $0x3a8] sm:$0xff] }
  0xac   : > { %669 = vmatmul.f32.gmra.mxu1 %v1997_v43 }
  0xad   : > { %782 = vmatmul.f32.gmra.mxu2 %v2029_v44  ;;  %895 = vmatmul.f32.gmra.mxu3 %v2841_v47  ;;  %v2207_v47 = vld [vmem:[%s3633_s1 + $0x348] sm:$0xff] }
  0xae   : > { %1351 = vmatpush.msra.mxu2 %v2207_v47 }
  0xb0   : > { %1352 = vmatpush.msra.mxu2 %v2206_v11 }
  0xb1   : > { %v2965_v49 = vpop.f32.mrf.mxu1  ;;  %1008 = vmatmul.f32.gmra.mxu0 %v1995_v34 }
  0xb2   : > { %1353 = vmatpush.msra.mxu2 %v2205_v31 }
  0xb4   : > { %672 = vmatmul.f32.gmra.mxu1 %v1998_v50  ;;  %1354 = vmatpush.msra.mxu2 %v2204_v45 }
  0xb5   : > { %785 = vmatmul.f32.gmra.mxu2 %v2030_v51  ;;  %898 = vmatmul.f32.gmra.mxu3 %v2869_v58  ;;  %v1999_v58 = vld [vmem:[%s2566_s26 + $0x81] sm:$0xff] }
  0xb6   : > { %v2976_v55 = vpop.f32.mrf.mxu0 }
  0xb8   : > { %v2978_v57 = vpop.f32.mrf.mxu2  ;;  %v2980_v61 = vpop.f32.mrf.mxu3 }
  0xb9   : > { %v2982_v63 = vpop.f32.mrf.mxu1  ;;  %1011 = vmatmul.f32.gmra.mxu0 %v1996_v39  ;;  %v362_v39 = vld [vmem:[%s3633_s1 + $0x138] sm:$0xff] }
  0xba   : > { %1092 = vmatpush.msra.mxu1 %v362_v39 }
  0xbc   : > { %675 = vmatmul.f32.gmra.mxu1 %v1999_v58 }
  0xbd   : > { %788 = vmatmul.f32.gmra.mxu2 %v2031_v1  ;;  %901 = vmatmul.f32.gmra.mxu3 %v2888_v2  ;;  %v2000_v2 = vld [vmem:[%s2566_s26 + $0x91] sm:$0xff] }
  0xbe   : > { %v2993_v5 = vpop.f32.mrf.mxu0  ;;  %v2037_v1 = vld [vmem:[%s2566_s26 + $0xca] sm:$0xff]  ;;  %1093 = vmatpush.msra.mxu1 %v361_v3 }
  0xc0   : > { %v2995_v6 = vpop.f32.mrf.mxu2  ;;  %v2997_v7 = vpop.f32.mrf.mxu3 }
  0xc1   : > { %v2999_v9 = vpop.f32.mrf.mxu1  ;;  %1014 = vmatmul.f32.gmra.mxu0 %v1997_v43 }
  0xc4   : > { %678 = vmatmul.f32.gmra.mxu1 %v2000_v2 }
  0xc5   : > { %791 = vmatmul.f32.gmra.mxu2 %v2032_v10  ;;  %904 = vmatmul.f32.gmra.mxu3 %v2572_v16  ;;  %v2001_v16 = vld [vmem:[%s2566_s26 + $0x99] sm:$0xff] }
  0xc6   : > { %v3010_v13 = vpop.f32.mrf.mxu0 }
  0xc8   : > { %v3012_v15 = vpop.f32.mrf.mxu2  ;;  %v3014_v19 = vpop.f32.mrf.mxu3 }
  0xc9   : > { %v3016_v20 = vpop.f32.mrf.mxu1  ;;  %1017 = vmatmul.f32.gmra.mxu0 %v1998_v50  ;;  %v2220_v50 = vld [vmem:[%s3633_s1 + $0x3b0] sm:$0xff] }
  0xca   : > { %1467 = vmatpush.msra.mxu3 %v2220_v50 }
  0xcc   : > { %681 = vmatmul.f32.gmra.mxu1 %v2001_v16  ;;  %1468 = vmatpush.msra.mxu3 %v2219_v22  ;;  %v2218_v22 = vld [vmem:[%s3633_s1 + $0x3a0] sm:$0xff] }
  0xcd   : > { %794 = vmatmul.f32.gmra.mxu2 %v2033_v21  ;;  %907 = vmatmul.f32.gmra.mxu3 %v2615_v30  ;;  %v2002_v30 = vld [vmem:[%s2566_s26 + $0xa9] sm:$0xff] }
  0xce   : > { %v3027_v25 = vpop.f32.mrf.mxu0  ;;  %v2203_v21 = vld [vmem:[%s3633_s1 + $0x328] sm:$0xff]  ;;  %1469 = vmatpush.msra.mxu3 %v2218_v22 }
  0xcf   : > { %1355 = vmatpush.msra.mxu2 %v2203_v21 }
  0xd0   : > { %v3029_v26 = vpop.f32.mrf.mxu2  ;;  %v3031_v24 = vpop.f32.mrf.mxu3 }
  0xd1   : > { %v3033_v28 = vpop.f32.mrf.mxu1  ;;  %1020 = vmatmul.f32.gmra.mxu0 %v1999_v58 }
  0xd4   : > { %684 = vmatmul.f32.gmra.mxu1 %v2002_v30 }
  0xd5   : > { %797 = vmatmul.f32.gmra.mxu2 %v2034_v29  ;;  %910 = vmatmul.f32.gmra.mxu3 %v2664_v46  ;;  %v2003_v46 = vld [vmem:[%s2566_s26 + $0xb1] sm:$0xff] }
  0xd6   : > { %v3044_v33 = vpop.f32.mrf.mxu0 }
  0xd8   : > { %v3046_v34 = vpop.f32.mrf.mxu2  ;;  %v3048_v36 = vpop.f32.mrf.mxu3 }
  0xd9   : > { %v3050_v56 = vpop.f32.mrf.mxu1  ;;  %1023 = vmatmul.f32.gmra.mxu0 %v2000_v2 }
  0xdc   : > { %687 = vmatmul.f32.gmra.mxu1 %v2003_v46 }
  0xdd   : > { %800 = vmatmul.f32.gmra.mxu2 %v2035_v38  ;;  %913 = vmatmul.f32.gmra.mxu3 %v2713_v62  ;;  %v2004_v62 = vld [vmem:[%s2566_s26 + $0xc1] sm:$0xff] }
  0xde   : > { %v3061_v8 = vpop.f32.mrf.mxu0  ;;  %v2007_v38 = vld [vmem:[%s2566_s26 + $0xe1] sm:$0xff] }
  0xe0   : > { %v3063_v42 = vpop.f32.mrf.mxu2  ;;  %v3065_v43 = vpop.f32.mrf.mxu3 }
  0xe1   : > { %v3067_v44 = vpop.f32.mrf.mxu1  ;;  %1026 = vmatmul.f32.gmra.mxu0 %v2001_v16  ;;  %v2006_v16 = vld [vmem:[%s2566_s26 + $0xd9] sm:$0xff] }
  0xe4   : > { %690 = vmatmul.f32.gmra.mxu1 %v2004_v62 }
  0xe5   : > { %803 = vmatmul.f32.gmra.mxu2 %v2036_v27  ;;  %916 = vmatmul.f32.gmra.mxu3 %v2762_v14  ;;  %v2005_v14 = vld [vmem:[%s2566_s26 + $0xc9] sm:$0xff] }
  0xe6   : > { %v3078_v51 = vpop.f32.mrf.mxu0  ;;  %v2235_v27 = vld [vmem:[%s3633_s1 + $0x428] sm:$0xff] }
  0xe7   : > { %1581 = vmatpush.msra.mxu0 %v2235_v27 }
  0xe8   : > { %v3080_v47 = vpop.f32.mrf.mxu2  ;;  %v3082_v54 = vpop.f32.mrf.mxu3 }
  0xe9   : > { %v3084_v58 = vpop.f32.mrf.mxu1  ;;  %1029 = vmatmul.f32.gmra.mxu0 %v2002_v30 }
  0xec   : > { %693 = vmatmul.f32.gmra.mxu1 %v2005_v14 }
  0xed   : > { %806 = vmatmul.f32.gmra.mxu2 %v2037_v1  ;;  %919 = vmatmul.f32.gmra.mxu3 %v2811_v35  ;;  %v2038_v35 = vld [vmem:[%s2566_s26 + $0xda] sm:$0xff] }
  0xee   : > { %v3095_v2 = vpop.f32.mrf.mxu0 }
  0xf0   : > { %v3097_v10 = vpop.f32.mrf.mxu2  ;;  %v3099_v11 = vpop.f32.mrf.mxu3 }
  0xf1   : > { %v649_v12 = vpop.f32.mrf.mxu1  ;;  %1032 = vmatmul.f32.gmra.mxu0 %v2003_v46 }
  0xf2   : > { %v650_v30 = vadd.f32 %v649_v12, %v2976_v55  ;;  %v360_v55 = vld [vmem:[%s3633_s1 + $0x128] sm:$0xff]  ;;  %v2008_v12 = vld [vmem:[%s2566_s26 + $0xf1] sm:$0xff] }
  0xf3   : > { %1094 = vmatpush.msra.mxu1 %v360_v55  ;;  %v2234_v55 = vld [vmem:[%s3633_s1 + $0x420] sm:$0xff] }
  0xf4   : > { %696 = vmatmul.f32.gmra.mxu1 %v2006_v16  ;;  %1582 = vmatpush.msra.mxu0 %v2234_v55 }
  0xf5   : > { %809 = vmatmul.f32.gmra.mxu2 %v2038_v35  ;;  %922 = vmatmul.f32.gmra.mxu3 %v2854_v52  ;;  %v2039_v52 = vld [vmem:[%s2566_s26 + $0xe2] sm:$0xff] }
  0xf6   : > { %v988_v23 = vpop.f32.mrf.mxu0 }
  0xf8   : > { %v762_v29 = vpop.f32.mrf.mxu2  ;;  %v875_v31 = vpop.f32.mrf.mxu3 }
  0xf9   : > { %v763_v40 = vadd.f32 %v762_v29, %v650_v30  ;;  %v652_v46 = vpop.f32.mrf.mxu1  ;;  %1035 = vmatmul.f32.gmra.mxu0 %v2004_v62 }
  0xfa   : > { %v653_v62 = vadd.f32 %v652_v46, %v2993_v5  ;;  %v2202_v5 = vld [vmem:[%s3633_s1 + $0x320] sm:$0xff] }
  0xfb   : > { %v876_v39 = vadd.f32 %v875_v31, %v763_v40  ;;  %1356 = vmatpush.msra.mxu2 %v2202_v5  ;;  %v2009_v46 = vld [vmem:[%s2566_s26 + $0xf9] sm:$0xff] }
  0xfc   : > { %699 = vmatmul.f32.gmra.mxu1 %v2007_v38 }
  0xfd   : > { %v3113_v41 = vadd.f32 %v988_v23, %v876_v39  ;;  %812 = vmatmul.f32.gmra.mxu2 %v2039_v52  ;;  %925 = vmatmul.f32.gmra.mxu3 %v2873_v59  ;;  %v2040_v59 = vld [vmem:[%s2566_s26 + $0xf2] sm:$0xff] }
  0xfe   : > { %v991_v45 = vpop.f32.mrf.mxu0 }
 0x100   : > { %v765_v50 = vpop.f32.mrf.mxu2  ;;  %v878_v1 = vpop.f32.mrf.mxu3 }
 0x101   : > { %v766_v3 = vadd.f32 %v765_v50, %v653_v62  ;;  %v655_v4 = vpop.f32.mrf.mxu1  ;;  %1038 = vmatmul.f32.gmra.mxu0 %v2005_v14 }
 0x102   : > { %v656_v14 = vadd.f32 %v655_v4, %v3010_v13  ;;  %v359_v13 = vld [vmem:[%s3633_s1 + $0x120] sm:$0xff] }
 0x103   : > { %v879_v35 = vadd.f32 %v878_v1, %v766_v3  ;;  %1095 = vmatpush.msra.mxu1 %v359_v13  ;;  %v2010_v3 = vld [vmem:[%s2566_s26 + $0x109] sm:$0xff] }
 0x104   : > { %702 = vmatmul.f32.gmra.mxu1 %v2008_v12 }
 0x105   : > { %v3125_v21 = vadd.f32 %v991_v45, %v879_v35  ;;  %815 = vmatmul.f32.gmra.mxu2 %v2040_v59  ;;  %928 = vmatmul.f32.gmra.mxu3 %v2575_v17  ;;  %v2041_v17 = vld [vmem:[%s2566_s26 + $0xfa] sm:$0xff] }
 0x106   : > { %v994_v23 = vpop.f32.mrf.mxu0  ;;  %v2217_v35 = vld [vmem:[%s3633_s1 + $0x398] sm:$0xff] }
 0x107   : > { %1470 = vmatpush.msra.mxu3 %v2217_v35 }
 0x108   : > { %v768_v30 = vpop.f32.mrf.mxu2  ;;  %v881_v29 = vpop.f32.mrf.mxu3 }
 0x109   : > { %v769_v31 = vadd.f32 %v768_v30, %v656_v14  ;;  %v658_v40 = vpop.f32.mrf.mxu1  ;;  %1041 = vmatmul.f32.gmra.mxu0 %v2006_v16 }
 0x10a   : > { %v659_v16 = vadd.f32 %v658_v40, %v3027_v25  ;;  %v2201_v25 = vld [vmem:[%s3633_s1 + $0x318] sm:$0xff] }
 0x10b   : > { %v882_v52 = vadd.f32 %v881_v29, %v769_v31  ;;  %1357 = vmatpush.msra.mxu2 %v2201_v25  ;;  %v2011_v29 = vld [vmem:[%s2566_s26 + $0x111] sm:$0xff] }
 0x10c   : > { %705 = vmatmul.f32.gmra.mxu1 %v2009_v46 }
 0x10d   : > { %v3137_v39 = vadd.f32 %v994_v23, %v882_v52  ;;  %818 = vmatmul.f32.gmra.mxu2 %v2041_v17  ;;  %931 = vmatmul.f32.gmra.mxu3 %v2621_v32  ;;  %v2042_v32 = vld [vmem:[%s2566_s26 + $0x10a] sm:$0xff]  ;;  %v2233_v17 = vld [vmem:[%s3633_s1 + $0x418] sm:$0xff] }
 0x10e   : > { %v997_v27 = vpop.f32.mrf.mxu0  ;;  %1583 = vmatpush.msra.mxu0 %v2233_v17 }
 0x110   : > { %v771_v45 = vpop.f32.mrf.mxu2  ;;  %v884_v62 = vpop.f32.mrf.mxu3 }
 0x111   : > { %v772_v50 = vadd.f32 %v771_v45, %v659_v16  ;;  %v661_v1 = vpop.f32.mrf.mxu1  ;;  %1044 = vmatmul.f32.gmra.mxu0 %v2007_v38  ;;  %v2012_v45 = vld [vmem:[%s2566_s26 + $0x121] sm:$0xff] }
 0x112   : > { %v662_v38 = vadd.f32 %v661_v1, %v3044_v33  ;;  %v358_v33 = vld [vmem:[%s3633_s1 + $0x118] sm:$0xff]  ;;  %v2216_v1 = vld [vmem:[%s3633_s1 + $0x390] sm:$0xff] }
 0x113   : > { %v885_v4 = vadd.f32 %v884_v62, %v772_v50  ;;  %1096 = vmatpush.msra.mxu1 %v358_v33  ;;  %1471 = vmatpush.msra.mxu3 %v2216_v1  ;;  %v2015_v1 = vld [vmem:[%s2566_s26 + $0x141] sm:$0xff] }
 0x114   : > { %708 = vmatmul.f32.gmra.mxu1 %v2010_v3 }
 0x115   : > { %v3149_v59 = vadd.f32 %v997_v27, %v885_v4  ;;  %821 = vmatmul.f32.gmra.mxu2 %v2042_v32  ;;  %934 = vmatmul.f32.gmra.mxu3 %v2670_v48  ;;  %v2043_v48 = vld [vmem:[%s2566_s26 + $0x112] sm:$0xff] }
 0x116   : > { %v1000_v5 = vpop.f32.mrf.mxu0 }
 0x118   : > { %v774_v22 = vpop.f32.mrf.mxu2  ;;  %v887_v23 = vpop.f32.mrf.mxu3 }
 0x119   : > { %v775_v14 = vadd.f32 %v774_v22, %v662_v38  ;;  %v664_v30 = vpop.f32.mrf.mxu1  ;;  %1047 = vmatmul.f32.gmra.mxu0 %v2008_v12  ;;  %v2013_v38 = vld [vmem:[%s2566_s26 + $0x129] sm:$0xff] }
 0x11a   : > { %v665_v12 = vadd.f32 %v664_v30, %v3061_v8  ;;  %v2200_v8 = vld [vmem:[%s3633_s1 + $0x310] sm:$0xff] }
 0x11b   : > { %v888_v31 = vadd.f32 %v887_v23, %v775_v14  ;;  %1358 = vmatpush.msra.mxu2 %v2200_v8  ;;  %v2232_v14 = vld [vmem:[%s3633_s1 + $0x410] sm:$0xff] }
 0x11c   : > { %711 = vmatmul.f32.gmra.mxu1 %v2011_v29  ;;  %1584 = vmatpush.msra.mxu0 %v2232_v14  ;;  %v3222_v14 = vld [vmem:[%s2566_s26 + $0x138] sm:$0xff] }
 0x11d   : > { %v3161_v40 = vadd.f32 %v1000_v5, %v888_v31  ;;  %824 = vmatmul.f32.gmra.mxu2 %v2043_v48  ;;  %937 = vmatmul.f32.gmra.mxu3 %v2719_v0  ;;  %v2044_v0 = vld [vmem:[%s2566_s26 + $0x122] sm:$0xff] }
 0x11e   : > { %v1003_v52 = vpop.f32.mrf.mxu0 }
 0x120   : > { %v777_v13 = vpop.f32.mrf.mxu2  ;;  %v890_v55 = vpop.f32.mrf.mxu3 }
 0x121   : > { %v778_v27 = vadd.f32 %v777_v13, %v665_v12  ;;  %v667_v16 = vpop.f32.mrf.mxu1  ;;  %1050 = vmatmul.f32.gmra.mxu0 %v2009_v46 }
 0x122   : > { %v668_v46 = vadd.f32 %v667_v16, %v3078_v51  ;;  %v357_v51 = vld [vmem:[%s3633_s1 + $0x110] sm:$0xff] }
 0x123   : > { %v891_v62 = vadd.f32 %v890_v55, %v778_v27  ;;  %1097 = vmatpush.msra.mxu1 %v357_v51  ;;  %v2215_v55 = vld [vmem:[%s3633_s1 + $0x388] sm:$0xff]  ;;  %v2016_v51 = vld [vmem:[%s2566_s26 + $0x151] sm:$0xff] }
 0x124   : > { %714 = vmatmul.f32.gmra.mxu1 %v2012_v45  ;;  %1472 = vmatpush.msra.mxu3 %v2215_v55  ;;  %v2049_v55 = vld [vmem:[%s2566_s26 + $0x15a] sm:$0xff] }
 0x125   : > { %v3173_v50 = vadd.f32 %v1003_v52, %v891_v62  ;;  %827 = vmatmul.f32.gmra.mxu2 %v2044_v0  ;;  %940 = vmatmul.f32.gmra.mxu3 %v2768_v18  ;;  %v2045_v18 = vld [vmem:[%s2566_s26 + $0x12a] sm:$0xff]  ;;  %v2014_v52 = vld [vmem:[%s2566_s26 + $0x139] sm:$0xff] }
 0x126   : > { %v1006_v32 = vpop.f32.mrf.mxu0 }
 0x128   : > { %v780_v4 = vpop.f32.mrf.mxu2  ;;  %v893_v25 = vpop.f32.mrf.mxu3 }
 0x129   : > { %v781_v35 = vadd.f32 %v780_v4, %v668_v46  ;;  %v670_v5 = vpop.f32.mrf.mxu1  ;;  %1053 = vmatmul.f32.gmra.mxu0 %v2010_v3  ;;  %v2231_v4 = vld [vmem:[%s3633_s1 + $0x408] sm:$0xff] }
 0x12a   : > { %v671_v3 = vadd.f32 %v670_v5, %v3095_v2  ;;  %v2199_v2 = vld [vmem:[%s3633_s1 + $0x308] sm:$0xff]  ;;  %1585 = vmatpush.msra.mxu0 %v2231_v4 }
 0x12b   : > { %v894_v22 = vadd.f32 %v893_v25, %v781_v35  ;;  %1359 = vmatpush.msra.mxu2 %v2199_v2  ;;  %v2017_v2 = vld [vmem:[%s2566_s26 + $0x159] sm:$0xff]  ;;  %v2018_v4 = vld [vmem:[%s2566_s26 + $0x169] sm:$0xff] }
 0x12c   : > { %717 = vmatmul.f32.gmra.mxu1 %v2013_v38 }
 0x12d   : > { %v3185_v23 = vadd.f32 %v1006_v32, %v894_v22  ;;  %830 = vmatmul.f32.gmra.mxu2 %v2045_v18  ;;  %943 = vmatmul.f32.gmra.mxu3 %v2817_v37  ;;  %v2046_v37 = vld [vmem:[%s2566_s26 + $0x13a] sm:$0xff] }
 0x12e   : > { %v1009_v30 = vpop.f32.mrf.mxu0 }
 0x130   : > { %v783_v48 = vpop.f32.mrf.mxu2  ;;  %v896_v31 = vpop.f32.mrf.mxu3 }
 0x131   : > { %v784_v33 = vadd.f32 %v783_v48, %v671_v3  ;;  %v673_v17 = vpop.f32.mrf.mxu1  ;;  %1056 = vmatmul.f32.gmra.mxu0 %v2011_v29 }
 0x132   : > { %v674_v29 = vadd.f32 %v673_v17, %v2965_v49  ;;  %v356_v49 = vld [vmem:[%s3633_s1 + $0x108] sm:$0xff] }
 0x133   : > { %v897_v12 = vadd.f32 %v896_v31, %v784_v33  ;;  %1098 = vmatpush.msra.mxu1 %v356_v49 }
 0x134   : > { %720 = vmatmul.f32.gmra.mxu1 %v2014_v52 }
 0x135   : > { %v3197_v13 = vadd.f32 %v1009_v30, %v897_v12  ;;  %833 = vmatmul.f32.gmra.mxu2 %v2046_v37  ;;  %946 = vmatmul.f32.gmra.mxu3 %v2857_v53  ;;  %v2047_v53 = vld [vmem:[%s2566_s26 + $0x142] sm:$0xff] }
 0x136   : > { %v1012_v27 = vpop.f32.mrf.mxu0 }
 0x138   : > { %v786_v16 = vpop.f32.mrf.mxu2  ;;  %v899_v0 = vpop.f32.mrf.mxu3 }
 0x139   : > { %v787_v62 = vadd.f32 %v786_v16, %v674_v29  ;;  %v676_v8 = vpop.f32.mrf.mxu1  ;;  %1059 = vmatmul.f32.gmra.mxu0 %v2012_v45 }
 0x13a   : > { %v677_v25 = vadd.f32 %v676_v8, %v2982_v63  ;;  %v2198_v63 = vld [vmem:[%s3633_s1 + $0x300] sm:$0xff] }
 0x13b   : > { %v900_v32 = vadd.f32 %v899_v0, %v787_v62  ;;  %1360 = vmatpush.msra.mxu2 %v2198_v63 }
 0x13c   : > { %723 = vmatmul.f32.gmra.mxu1 %v2015_v1 }
 0x13d   : > { %v3209_v46 = vadd.f32 %v1012_v27, %v900_v32  ;;  %836 = vmatmul.f32.gmra.mxu2 %v2047_v53  ;;  %949 = vmatmul.f32.gmra.mxu3 %v2876_v60  ;;  %v2048_v60 = vld [vmem:[%s2566_s26 + $0x152] sm:$0xff]  ;;  %v3237_v27 = vld [vmem:[%s2566_s26 + $0x140] sm:$0xff] }
 0x13e   : > { %v1015_v45 = vpop.f32.mrf.mxu0 }
 0x140   : > { %v789_v35 = vpop.f32.mrf.mxu2  ;;  %v902_v5 = vpop.f32.mrf.mxu3 }
 0x141   : > { %v790_v18 = vadd.f32 %v789_v35, %v677_v25  ;;  %v679_v22 = vpop.f32.mrf.mxu1  ;;  %1062 = vmatmul.f32.gmra.mxu0 %v2013_v38  ;;  %v2214_v38 = vld [vmem:[%s3633_s1 + $0x380] sm:$0xff]  ;;  %v3252_v25 = vld [vmem:[%s2566_s26 + $0x150] sm:$0xff] }
 0x142   : > { %1473 = vmatpush.msra.mxu3 %v2214_v38  ;;  %v680_v31 = vadd.f32 %v679_v22, %v2999_v9  ;;  %v355_v9 = vld [vmem:[%s3633_s1 + $0x100] sm:$0xff]  ;;  %v2051_v38 = vld [vmem:[%s2566_s26 + $0x172] sm:$0xff] }
 0x143   : > { %v903_v30 = vadd.f32 %v902_v5, %v790_v18  ;;  %1099 = vmatpush.msra.mxu1 %v355_v9  ;;  %v2052_v9 = vld [vmem:[%s2566_s26 + $0x182] sm:$0xff] }
 0x144   : > { %726 = vmatmul.f32.gmra.mxu1 %v2016_v51 }
 0x145   : > { %v3224_v3 = vadd.f32 %v1015_v45, %v903_v30  ;;  %839 = vmatmul.f32.gmra.mxu2 %v2048_v60  ;;  %952 = vmatmul.f32.gmra.mxu3 %v3222_v14  ;;  %v2050_v45 = vld [vmem:[%s2566_s26 + $0x16a] sm:$0xff] }
 0x146   : > { %v1018_v48 = vpop.f32.mrf.mxu0 }
 0x148   : > { %v792_v33 = vpop.f32.mrf.mxu2  ;;  %v905_v17 = vpop.f32.mrf.mxu3 }
 0x149   : > { %v793_v37 = vadd.f32 %v792_v33, %v680_v31  ;;  %v682_v12 = vpop.f32.mrf.mxu1  ;;  %1065 = vmatmul.f32.gmra.mxu0 %v2014_v52  ;;  %v2230_v52 = vld [vmem:[%s3633_s1 + $0x400] sm:$0xff] }
 0x14a   : > { %1586 = vmatpush.msra.mxu0 %v2230_v52  ;;  %v683_v62 = vadd.f32 %v682_v12, %v3016_v20  ;;  %v3270_v52 = vld [vmem:[%s2566_s26 + $0x168] sm:$0xff] }
 0x14b   : > { %v906_v29 = vadd.f32 %v905_v17, %v793_v37 }
 0x14c   : > { %729 = vmatmul.f32.gmra.mxu1 %v2017_v2 }
 0x14d   : > { %v3239_v16 = vadd.f32 %v1018_v48, %v906_v29  ;;  %842 = vmatmul.f32.gmra.mxu2 %v2049_v55  ;;  %955 = vmatmul.f32.gmra.mxu3 %v3237_v27  ;;  %v3261_v48 = vld [vmem:[%s2566_s26 + $0x158] sm:$0xff] }
 0x14e   : > { %v1021_v0 = vpop.f32.mrf.mxu0 }
 0x150   : > { %v795_v8 = vpop.f32.mrf.mxu2  ;;  %v908_v53 = vpop.f32.mrf.mxu3 }
 0x151   : > { %v796_v32 = vadd.f32 %v795_v8, %v683_v62  ;;  %v685_v49 = vpop.f32.mrf.mxu1  ;;  %1068 = vmatmul.f32.gmra.mxu0 %v2015_v1  ;;  %v2019_v1 = vld [vmem:[%s2566_s26 + $0x171] sm:$0xff] }
 0x152   : > { %v686_v18 = vadd.f32 %v685_v49, %v3033_v28 }
 0x153   : > { %v909_v35 = vadd.f32 %v908_v53, %v796_v32 }
 0x154   : > { %732 = vmatmul.f32.gmra.mxu1 %v2018_v4 }
 0x155   : > { %v3254_v5 = vadd.f32 %v1021_v0, %v909_v35  ;;  %845 = vmatmul.f32.gmra.mxu2 %v2050_v45  ;;  %958 = vmatmul.f32.gmra.mxu3 %v3252_v25  ;;  %v2053_v35 = vld [vmem:[%s2566_s26 + $0x18a] sm:$0xff] }
 0x156   : > { %v1024_v20 = vpop.f32.mrf.mxu0 }
 0x158   : > { %v798_v22 = vpop.f32.mrf.mxu2  ;;  %v911_v60 = vpop.f32.mrf.mxu3 }
 0x159   : > { %v799_v30 = vadd.f32 %v798_v22, %v686_v18  ;;  %v688_v63 = vpop.f32.mrf.mxu1  ;;  %1071 = vmatmul.f32.gmra.mxu0 %v2016_v51  ;;  %v2020_v51 = vld [vmem:[%s2566_s26 + $0x181] sm:$0xff] }
 0x15a   : > { %v689_v17 = vadd.f32 %v688_v63, %v3050_v56 }
 0x15b   : > { %v912_v31 = vadd.f32 %v911_v60, %v799_v30 }
 0x15c   : > { %735 = vmatmul.f32.gmra.mxu1 %v2019_v1 }
 0x15d   : > { %v3263_v33 = vadd.f32 %v1024_v20, %v912_v31  ;;  %848 = vmatmul.f32.gmra.mxu2 %v2051_v38  ;;  %961 = vmatmul.f32.gmra.mxu3 %v3261_v48  ;;  %v3279_v20 = vld [vmem:[%s2566_s26 + $0x170] sm:$0xff]  ;;  %v291_v31 = vld [vmem:[%s2566_s26 + $0x2] sm:$0xff] }
 0x15e   : > { %v1027_v28 = vpop.f32.mrf.mxu0 }
 0x160   : > { %v801_v37 = vpop.f32.mrf.mxu2  ;;  %v914_v12 = vpop.f32.mrf.mxu3 }
 0x161   : > { %v802_v55 = vadd.f32 %v801_v37, %v689_v17  ;;  %v691_v29 = vpop.f32.mrf.mxu1  ;;  %1074 = vmatmul.f32.gmra.mxu0 %v2017_v2  ;;  %v2021_v2 = vld [vmem:[%s2566_s26 + $0x189] sm:$0xff]  ;;  %v2134_v17 = vld [vmem:[%s2566_s26 + $0x31] sm:$0xff] }
 0x162   : > { %v692_v8 = vadd.f32 %v691_v29, %v3067_v44  ;;  %v2166_v29 = vld [vmem:[%s2566_s26 + $0x32] sm:$0xff] }
 0x163   : > { %v915_v0 = vadd.f32 %v914_v12, %v802_v55 }
 0x164   : > { %738 = vmatmul.f32.gmra.mxu1 %v2020_v51 }
 0x165   : > { %v3272_v62 = vadd.f32 %v1027_v28, %v915_v0  ;;  %851 = vmatmul.f32.gmra.mxu2 %v2052_v9  ;;  %964 = vmatmul.f32.gmra.mxu3 %v3270_v52  ;;  %v2102_v28 = vld [vmem:[%s2566_s26 + $0x30] sm:$0xff] }
 0x166   : > { %v1030_v56 = vpop.f32.mrf.mxu0 }
 0x168   : > { %v804_v53 = vpop.f32.mrf.mxu2  ;;  %v917_v32 = vpop.f32.mrf.mxu3 }
 0x169   : > { %v805_v49 = vadd.f32 %v804_v53, %v692_v8  ;;  %v694_v45 = vpop.f32.mrf.mxu1  ;;  %1077 = vmatmul.f32.gmra.mxu0 %v2018_v4  ;;  %v2103_v8 = vld [vmem:[%s2566_s26 + $0x38] sm:$0xff] }
 0x16a   : > { %v695_v60 = vadd.f32 %v694_v45, %v3084_v58  ;;  %v2135_v53 = vld [vmem:[%s2566_s26 + $0x39] sm:$0xff] }
 0x16b   : > { %v918_v18 = vadd.f32 %v917_v32, %v805_v49 }
 0x16c   : > { %741 = vmatmul.f32.gmra.mxu1 %v2021_v2  ;;  %v2167_v2 = vld [vmem:[%s2566_s26 + $0x3a] sm:$0xff] }
 0x16d   : > { %v3281_v22 = vadd.f32 %v1030_v56, %v918_v18  ;;  %854 = vmatmul.f32.gmra.mxu2 %v2053_v35  ;;  %967 = vmatmul.f32.gmra.mxu3 %v3279_v20  ;;  %v292_v56 = vld [vmem:[%s2566_s26 + $0xa] sm:$0xff] }
 0x16e   : > { %v1033_v44 = vpop.f32.mrf.mxu0 }
 0x170   : > { %v807_v30 = vpop.f32.mrf.mxu2  ;;  %v920_v63 = vpop.f32.mrf.mxu3 }
 0x171   : > { %v808_v38 = vadd.f32 %v807_v30, %v695_v60  ;;  %v697_v4 = vpop.f32.mrf.mxu1  ;;  %1080 = vmatmul.f32.gmra.mxu0 %v2019_v1  ;;  %v293_v30 = vld [vmem:[%s2566_s26 + $0x1a] sm:$0xff] }
 0x172   : > { %v698_v58 = vadd.f32 %v697_v4, %v2978_v57 }
 0x173   : > { %v921_v37 = vadd.f32 %v920_v63, %v808_v38  ;;  %v2104_v63 = vld [vmem:[%s2566_s26 + $0x48] sm:$0xff] }
 0x174   : > { %1100 = vmatmul.f32.vlgmr.msra.gmra.mxu1 %v291_v31  ;;  %v2136_v38 = vld [vmem:[%s2566_s26 + $0x49] sm:$0xff] }
 0x175   : > { %v3288_v12 = vadd.f32 %v1033_v44, %v921_v37  ;;  %1361 = vmatmul.f32.vlgmr.msra.gmra.mxu2 %v2102_v28  ;;  %1474 = vmatmul.f32.vlgmr.msra.gmra.mxu3 %v2134_v17  ;;  %v2168_v17 = vld [vmem:[%s2566_s26 + $0x4a] sm:$0xff] }
 0x176   : > { %v1036_v55 = vpop.f32.mrf.mxu0 }
 0x178   : > { %v810_v51 = vpop.f32.mrf.mxu2  ;;  %v923_v9 = vpop.f32.mrf.mxu3 }
 0x179   : > { %v811_v1 = vadd.f32 %v810_v51, %v698_v58  ;;  %v700_v0 = vpop.f32.mrf.mxu1  ;;  %1587 = vmatmul.f32.vlgmr.msra.gmra.mxu0 %v2166_v29 }
 0x17a   : > { %v701_v57 = vadd.f32 %v700_v0, %v2995_v6  ;;  %v2137_v0 = vld [vmem:[%s2566_s26 + $0x51] sm:$0xff] }
 0x17b   : > { %v924_v32 = vadd.f32 %v923_v9, %v811_v1  ;;  %v294_v9 = vld [vmem:[%s2566_s26 + $0x22] sm:$0xff]  ;;  %v2105_v1 = vld [vmem:[%s2566_s26 + $0x50] sm:$0xff] }
 0x17c   : > { %1103 = vmatmul.f32.gmra.mxu1 %v292_v56 }
 0x17d   : > { %v3295_v49 = vadd.f32 %v1036_v55, %v924_v32  ;;  %1364 = vmatmul.f32.gmra.mxu2 %v2103_v8  ;;  %1477 = vmatmul.f32.gmra.mxu3 %v2135_v53  ;;  %v2169_v32 = vld [vmem:[%s2566_s26 + $0x52] sm:$0xff] }
 0x17e   : > { %v1039_v45 = vpop.f32.mrf.mxu0 }
 0x180   : > { %v813_v35 = vpop.f32.mrf.mxu2  ;;  %v926_v18 = vpop.f32.mrf.mxu3 }
 0x181   : > { %v814_v44 = vadd.f32 %v813_v35, %v701_v57  ;;  %v703_v60 = vpop.f32.mrf.mxu1  ;;  %1590 = vmatmul.f32.gmra.mxu0 %v2167_v2 }
 0x182   : > { %v704_v6 = vadd.f32 %v703_v60, %v3012_v15  ;;  %v2138_v60 = vld [vmem:[%s2566_s26 + $0x61] sm:$0xff] }
 0x183   : > { %v927_v4 = vadd.f32 %v926_v18, %v814_v44  ;;  %v2106_v44 = vld [vmem:[%s2566_s26 + $0x60] sm:$0xff] }
 0x184   : > { %1106 = vmatmul.f32.gmra.mxu1 %v293_v30 }
 0x185   : > { %v3302_v31 = vadd.f32 %v1039_v45, %v927_v4  ;;  %1367 = vmatmul.f32.gmra.mxu2 %v2104_v63  ;;  %1480 = vmatmul.f32.gmra.mxu3 %v2136_v38  ;;  %v2170_v4 = vld [vmem:[%s2566_s26 + $0x62] sm:$0xff] }
 0x186   : > { %v1042_v28 = vpop.f32.mrf.mxu0 }
 0x188   : > { %v816_v37 = vpop.f32.mrf.mxu2  ;;  %v929_v55 = vpop.f32.mrf.mxu3 }
 0x189   : > { %v817_v58 = vadd.f32 %v816_v37, %v704_v6  ;;  %v706_v51 = vpop.f32.mrf.mxu1  ;;  %1593 = vmatmul.f32.gmra.mxu0 %v2168_v17 }
 0x18a   : > { %v707_v15 = vadd.f32 %v706_v51, %v3029_v26  ;;  %v2139_v51 = vld [vmem:[%s2566_s26 + $0x69] sm:$0xff] }
 0x18b   : > { %v930_v56 = vadd.f32 %v929_v55, %v817_v58  ;;  %v2107_v58 = vld [vmem:[%s2566_s26 + $0x68] sm:$0xff] }
 0x18c   : > { %1109 = vmatmul.f32.gmra.mxu1 %v294_v9 }
 0x18d   : > { %v3309_v8 = vadd.f32 %v1042_v28, %v930_v56  ;;  %1370 = vmatmul.f32.gmra.mxu2 %v2105_v1  ;;  %1483 = vmatmul.f32.gmra.mxu3 %v2137_v0  ;;  %v2171_v0 = vld [vmem:[%s2566_s26 + $0x6a] sm:$0xff] }
 0x18e   : > { %v1045_v53 = vpop.f32.mrf.mxu0 }
 0x190   : > { %v819_v45 = vpop.f32.mrf.mxu2  ;;  %v932_v57 = vpop.f32.mrf.mxu3 }
 0x191   : > { %v820_v35 = vadd.f32 %v819_v45, %v707_v15  ;;  %v709_v18 = vpop.f32.mrf.mxu1  ;;  %1596 = vmatmul.f32.gmra.mxu0 %v2169_v32 }
 0x192   : > { %v710_v26 = vadd.f32 %v709_v18, %v3046_v34 }
 0x193   : > { %v933_v30 = vadd.f32 %v932_v57, %v820_v35  ;;  %v2108_v57 = vld [vmem:[%s2566_s26 + $0x78] sm:$0xff] }
 0x194   : > { %1112 = vmatmul.f32.gmra.mxu1 %v2166_v29  ;;  %v2140_v35 = vld [vmem:[%s2566_s26 + $0x79] sm:$0xff] }
 0x195   : > { %v3315_v63 = vadd.f32 %v1045_v53, %v933_v30  ;;  %1373 = vmatmul.f32.gmra.mxu2 %v2106_v44  ;;  %1486 = vmatmul.f32.gmra.mxu3 %v2138_v60  ;;  %v2172_v60 = vld [vmem:[%s2566_s26 + $0x7a] sm:$0xff] }
 0x196   : > { %v1048_v38 = vpop.f32.mrf.mxu0 }
 0x198   : > { %v822_v28 = vpop.f32.mrf.mxu2  ;;  %v935_v6 = vpop.f32.mrf.mxu3 }
 0x199   : > { %v823_v37 = vadd.f32 %v822_v28, %v710_v26  ;;  %v712_v55 = vpop.f32.mrf.mxu1  ;;  %1599 = vmatmul.f32.gmra.mxu0 %v2170_v4 }
 0x19a   : > { %v713_v34 = vadd.f32 %v712_v55, %v3063_v42 }
 0x19b   : > { %v936_v9 = vadd.f32 %v935_v6, %v823_v37  ;;  %v2109_v6 = vld [vmem:[%s2566_s26 + $0x80] sm:$0xff] }
 0x19c   : > { %1115 = vmatmul.f32.gmra.mxu1 %v2167_v2  ;;  %v2141_v37 = vld [vmem:[%s2566_s26 + $0x81] sm:$0xff] }
 0x19d   : > { %v3321_v29 = vadd.f32 %v1048_v38, %v936_v9  ;;  %1376 = vmatmul.f32.gmra.mxu2 %v2107_v58  ;;  %1489 = vmatmul.f32.gmra.mxu3 %v2139_v51  ;;  %v2173_v51 = vld [vmem:[%s2566_s26 + $0x82] sm:$0xff] }
 0x19e   : > { %v1051_v1 = vpop.f32.mrf.mxu0 }
 0x1a0   : > { %v825_v56 = vpop.f32.mrf.mxu2  ;;  %v938_v53 = vpop.f32.mrf.mxu3 }
 0x1a1   : > { %v826_v15 = vadd.f32 %v825_v56, %v713_v34  ;;  %v715_v45 = vpop.f32.mrf.mxu1  ;;  %1602 = vmatmul.f32.gmra.mxu0 %v2171_v0 }
 0x1a2   : > { %v716_v42 = vadd.f32 %v715_v45, %v3080_v47 }
 0x1a3   : > { %v939_v18 = vadd.f32 %v938_v53, %v826_v15  ;;  %v2110_v53 = vld [vmem:[%s2566_s26 + $0x90] sm:$0xff] }
 0x1a4   : > { %1118 = vmatmul.f32.gmra.mxu1 %v2168_v17  ;;  %v2142_v15 = vld [vmem:[%s2566_s26 + $0x91] sm:$0xff] }
 0x1a5   : > { %v3327_v2 = vadd.f32 %v1051_v1, %v939_v18  ;;  %1379 = vmatmul.f32.gmra.mxu2 %v2108_v57  ;;  %1492 = vmatmul.f32.gmra.mxu3 %v2140_v35  ;;  %v2174_v35 = vld [vmem:[%s2566_s26 + $0x92] sm:$0xff] }
 0x1a6   : > { %v1054_v44 = vpop.f32.mrf.mxu0 }
 0x1a8   : > { %v828_v30 = vpop.f32.mrf.mxu2  ;;  %v941_v38 = vpop.f32.mrf.mxu3 }
 0x1a9   : > { %v829_v26 = vadd.f32 %v828_v30, %v716_v42  ;;  %v718_v28 = vpop.f32.mrf.mxu1  ;;  %1605 = vmatmul.f32.gmra.mxu0 %v2172_v60 }
 0x1aa   : > { %v719_v47 = vadd.f32 %v718_v28, %v3097_v10 }
 0x1ab   : > { %v942_v55 = vadd.f32 %v941_v38, %v829_v26  ;;  %v2111_v38 = vld [vmem:[%s2566_s26 + $0x98] sm:$0xff] }
 0x1ac   : > { %1121 = vmatmul.f32.gmra.mxu1 %v2169_v32  ;;  %v2143_v26 = vld [vmem:[%s2566_s26 + $0x99] sm:$0xff] }
 0x1ad   : > { %v3333_v17 = vadd.f32 %v1054_v44, %v942_v55  ;;  %1382 = vmatmul.f32.gmra.mxu2 %v2109_v6  ;;  %1495 = vmatmul.f32.gmra.mxu3 %v2141_v37  ;;  %v2175_v37 = vld [vmem:[%s2566_s26 + $0x9a] sm:$0xff] }
 0x1ae   : > { %v1057_v58 = vpop.f32.mrf.mxu0 }
 0x1b0   : > { %v831_v9 = vpop.f32.mrf.mxu2  ;;  %v944_v1 = vpop.f32.mrf.mxu3 }
 0x1b1   : > { %v832_v34 = vadd.f32 %v831_v9, %v719_v47  ;;  %v721_v56 = vpop.f32.mrf.mxu1  ;;  %1608 = vmatmul.f32.gmra.mxu0 %v2173_v51 }
 0x1b2   : > { %v722_v10 = vadd.f32 %v721_v56, %v2980_v61 }
 0x1b3   : > { %v945_v45 = vadd.f32 %v944_v1, %v832_v34  ;;  %v2112_v1 = vld [vmem:[%s2566_s26 + $0xa8] sm:$0xff] }
 0x1b4   : > { %1124 = vmatmul.f32.gmra.mxu1 %v2170_v4  ;;  %v2144_v34 = vld [vmem:[%s2566_s26 + $0xa9] sm:$0xff] }
 0x1b5   : > { %v3339_v32 = vadd.f32 %v1057_v58, %v945_v45  ;;  %1385 = vmatmul.f32.gmra.mxu2 %v2110_v53  ;;  %1498 = vmatmul.f32.gmra.mxu3 %v2142_v15  ;;  %v2176_v15 = vld [vmem:[%s2566_s26 + $0xaa] sm:$0xff] }
 0x1b6   : > { %v1060_v57 = vpop.f32.mrf.mxu0 }
 0x1b8   : > { %v834_v18 = vpop.f32.mrf.mxu2  ;;  %v947_v44 = vpop.f32.mrf.mxu3 }
 0x1b9   : > { %v835_v42 = vadd.f32 %v834_v18, %v722_v10  ;;  %v724_v30 = vpop.f32.mrf.mxu1  ;;  %1611 = vmatmul.f32.gmra.mxu0 %v2174_v35 }
 0x1ba   : > { %v725_v61 = vadd.f32 %v724_v30, %v2997_v7 }
 0x1bb   : > { %v948_v28 = vadd.f32 %v947_v44, %v835_v42  ;;  %v2113_v44 = vld [vmem:[%s2566_s26 + $0xb0] sm:$0xff] }
 0x1bc   : > { %1127 = vmatmul.f32.gmra.mxu1 %v2171_v0  ;;  %v2145_v42 = vld [vmem:[%s2566_s26 + $0xb1] sm:$0xff] }
 0x1bd   : > { %v3345_v4 = vadd.f32 %v1060_v57, %v948_v28  ;;  %1388 = vmatmul.f32.gmra.mxu2 %v2111_v38  ;;  %1501 = vmatmul.f32.gmra.mxu3 %v2143_v26  ;;  %v2177_v26 = vld [vmem:[%s2566_s26 + $0xb2] sm:$0xff] }
 0x1be   : > { %v1063_v6 = vpop.f32.mrf.mxu0 }
 0x1c0   : > { %v837_v55 = vpop.f32.mrf.mxu2  ;;  %v950_v58 = vpop.f32.mrf.mxu3 }
 0x1c1   : > { %v838_v47 = vadd.f32 %v837_v55, %v725_v61  ;;  %v727_v9 = vpop.f32.mrf.mxu1  ;;  %1614 = vmatmul.f32.gmra.mxu0 %v2175_v37 }
 0x1c2   : > { %v728_v7 = vadd.f32 %v727_v9, %v3014_v19 }
 0x1c3   : > { %v951_v56 = vadd.f32 %v950_v58, %v838_v47  ;;  %v2114_v58 = vld [vmem:[%s2566_s26 + $0xc0] sm:$0xff] }
 0x1c4   : > { %1130 = vmatmul.f32.gmra.mxu1 %v2172_v60  ;;  %v2146_v47 = vld [vmem:[%s2566_s26 + $0xc1] sm:$0xff] }
 0x1c5   : > { %v3351_v0 = vadd.f32 %v1063_v6, %v951_v56  ;;  %1391 = vmatmul.f32.gmra.mxu2 %v2112_v1  ;;  %1504 = vmatmul.f32.gmra.mxu3 %v2144_v34  ;;  %v2178_v34 = vld [vmem:[%s2566_s26 + $0xc2] sm:$0xff] }
 0x1c6   : > { %v1066_v53 = vpop.f32.mrf.mxu0 }
 0x1c8   : > { %v840_v45 = vpop.f32.mrf.mxu2  ;;  %v953_v57 = vpop.f32.mrf.mxu3 }
 0x1c9   : > { %v841_v10 = vadd.f32 %v840_v45, %v728_v7  ;;  %v730_v18 = vpop.f32.mrf.mxu1  ;;  %1617 = vmatmul.f32.gmra.mxu0 %v2176_v15 }
 0x1ca   : > { %v731_v19 = vadd.f32 %v730_v18, %v3031_v24 }
 0x1cb   : > { %v954_v30 = vadd.f32 %v953_v57, %v841_v10  ;;  %v2115_v57 = vld [vmem:[%s2566_s26 + $0xc8] sm:$0xff] }
 0x1cc   : > { %1133 = vmatmul.f32.gmra.mxu1 %v2173_v51  ;;  %v2147_v10 = vld [vmem:[%s2566_s26 + $0xc9] sm:$0xff] }
 0x1cd   : > { %v3357_v60 = vadd.f32 %v1066_v53, %v954_v30  ;;  %1394 = vmatmul.f32.gmra.mxu2 %v2113_v44  ;;  %1507 = vmatmul.f32.gmra.mxu3 %v2145_v42  ;;  %v2179_v42 = vld [vmem:[%s2566_s26 + $0xca] sm:$0xff] }
 0x1ce   : > { %v1069_v38 = vpop.f32.mrf.mxu0 }
 0x1d0   : > { %v843_v28 = vpop.f32.mrf.mxu2  ;;  %v956_v6 = vpop.f32.mrf.mxu3 }
 0x1d1   : > { %v844_v61 = vadd.f32 %v843_v28, %v731_v19  ;;  %v733_v55 = vpop.f32.mrf.mxu1  ;;  %1620 = vmatmul.f32.gmra.mxu0 %v2177_v26 }
 0x1d2   : > { %v734_v24 = vadd.f32 %v733_v55, %v3048_v36 }
 0x1d3   : > { %v957_v9 = vadd.f32 %v956_v6, %v844_v61  ;;  %v2116_v6 = vld [vmem:[%s2566_s26 + $0xd8] sm:$0xff] }
 0x1d4   : > { %1136 = vmatmul.f32.gmra.mxu1 %v2174_v35  ;;  %v2148_v61 = vld [vmem:[%s2566_s26 + $0xd9] sm:$0xff] }
 0x1d5   : > { %v3363_v51 = vadd.f32 %v1069_v38, %v957_v9  ;;  %1397 = vmatmul.f32.gmra.mxu2 %v2114_v58  ;;  %1510 = vmatmul.f32.gmra.mxu3 %v2146_v47  ;;  %v2180_v47 = vld [vmem:[%s2566_s26 + $0xda] sm:$0xff] }
 0x1d6   : > { %v1072_v1 = vpop.f32.mrf.mxu0 }
 0x1d8   : > { %v846_v56 = vpop.f32.mrf.mxu2  ;;  %v959_v53 = vpop.f32.mrf.mxu3 }
 0x1d9   : > { %v847_v7 = vadd.f32 %v846_v56, %v734_v24  ;;  %v736_v45 = vpop.f32.mrf.mxu1  ;;  %1623 = vmatmul.f32.gmra.mxu0 %v2178_v34 }
 0x1da   : > { %v737_v36 = vadd.f32 %v736_v45, %v3065_v43 }
 0x1db   : > { %v960_v18 = vadd.f32 %v959_v53, %v847_v7  ;;  %v2117_v53 = vld [vmem:[%s2566_s26 + $0xe0] sm:$0xff] }
 0x1dc   : > { %1139 = vmatmul.f32.gmra.mxu1 %v2175_v37  ;;  %v2149_v7 = vld [vmem:[%s2566_s26 + $0xe1] sm:$0xff] }
 0x1dd   : > { %v3369_v35 = vadd.f32 %v1072_v1, %v960_v18  ;;  %1400 = vmatmul.f32.gmra.mxu2 %v2115_v57  ;;  %1513 = vmatmul.f32.gmra.mxu3 %v2147_v10  ;;  %v3384_v10 = vld [vmem:[%s2566_s26 + $0xe2] sm:$0xff] }
 0x1de   : > { %v1075_v44 = vpop.f32.mrf.mxu0 }
 0x1e0   : > { %v849_v30 = vpop.f32.mrf.mxu2  ;;  %v962_v38 = vpop.f32.mrf.mxu3 }
 0x1e1   : > { %v850_v19 = vadd.f32 %v849_v30, %v737_v36  ;;  %v739_v28 = vpop.f32.mrf.mxu1  ;;  %1626 = vmatmul.f32.gmra.mxu0 %v2179_v42 }
 0x1e2   : > { %v740_v43 = vadd.f32 %v739_v28, %v3082_v54 }
 0x1e3   : > { %v963_v55 = vadd.f32 %v962_v38, %v850_v19  ;;  %v2118_v38 = vld [vmem:[%s2566_s26 + $0xf0] sm:$0xff] }
 0x1e4   : > { %1142 = vmatmul.f32.gmra.mxu1 %v2176_v15 }
 0x1e5   : > { %v3375_v37 = vadd.f32 %v1075_v44, %v963_v55  ;;  %1403 = vmatmul.f32.gmra.mxu2 %v2116_v6  ;;  %1516 = vmatmul.f32.gmra.mxu3 %v2148_v61 }
 0x1e6   : > { %v1078_v58 = vpop.f32.mrf.mxu0 }
 0x1e8   : > { %v852_v9 = vpop.f32.mrf.mxu2  ;;  %v965_v1 = vpop.f32.mrf.mxu3 }
 0x1e9   : > { %v853_v24 = vadd.f32 %v852_v9, %v740_v43  ;;  %v742_v56 = vpop.f32.mrf.mxu1  ;;  %1629 = vmatmul.f32.gmra.mxu0 %v2180_v47  ;;  %v2119_v9 = vld [vmem:[%s2566_s26 + $0xf8] sm:$0xff] }
 0x1ea   : > { %v743_v54 = vadd.f32 %v742_v56, %v3099_v11  ;;  %v3393_v11 = vld [vmem:[%s2566_s26 + $0xf2] sm:$0xff]  ;;  %v3403_v56 = vld [vmem:[%s3634_s2] ss:$0 sm:$0xff] }
 0x1eb   : > { %v966_v45 = vadd.f32 %v965_v1, %v853_v24  ;;  %v2151_v1 = vld [vmem:[%s2566_s26 + $0xf9] sm:$0xff] }
 0x1ec   : > { %1145 = vmatmul.f32.gmra.mxu1 %v2177_v26  ;;  %v2150_v26 = vld [vmem:[%s2566_s26 + $0xf1] sm:$0xff] }
 0x1ed   : > { %v3381_v15 = vadd.f32 %v1078_v58, %v966_v45  ;;  %1406 = vmatmul.f32.gmra.mxu2 %v2117_v53  ;;  %1519 = vmatmul.f32.gmra.mxu3 %v2149_v7  ;;  %v3408_v45 = vld [vmem:[%s2566_s26 + $0xfa] sm:$0xff] }
 0x1ee   : > { %v1081_v57 = vpop.f32.mrf.mxu0 }
 0x1f0   : > { %v855_v18 = vpop.f32.mrf.mxu2  ;;  %v968_v44 = vpop.f32.mrf.mxu3 }
 0x1f1   : > { %v856_v36 = vadd.f32 %v855_v18, %v743_v54  ;;  %v1101_v30 = vpop.f32.mrf.mxu1  ;;  %1632 = vmatmul.f32.gmra.mxu0 %v3384_v10 }
 0x1f3   : > { %v969_v19 = vadd.f32 %v968_v44, %v856_v36 }
 0x1f4   : > { %1148 = vmatmul.f32.gmra.mxu1 %v2178_v34  ;;  %v1102_v34 = vadd.f32 %v1101_v30, %v3113_v41  ;;  %v2120_v30 = vld [vmem:[%s2566_s26 + $0x108] sm:$0xff] }
 0x1f5   : > { %v3390_v28 = vadd.f32 %v1081_v57, %v969_v19  ;;  %1409 = vmatmul.f32.gmra.mxu2 %v2118_v38  ;;  %1522 = vmatmul.f32.gmra.mxu3 %v2150_v26 }
 0x1f6   : > { %v1588_v6 = vpop.f32.mrf.mxu0 }
 0x1f8   : > { %v1362_v61 = vpop.f32.mrf.mxu2  ;;  %v1475_v55 = vpop.f32.mrf.mxu3 }
 0x1f9   : > { %v1476_v58 = vadd.f32 %v1475_v55, %v1362_v61  ;;  %v1104_v43 = vpop.f32.mrf.mxu1  ;;  %1635 = vmatmul.f32.gmra.mxu0 %v3393_v11  ;;  %v3419_v61 = vld [vmem:[%s2566_s26 + $0x10a] sm:$0xff] }
 0x1fa   : > { %v1105_v38 = vadd.f32 %v1104_v43, %v3125_v21 }
 0x1fb   : > { %v1589_v24 = vadd.f32 %v1588_v6, %v1476_v58 }
 0x1fc   : > { %1151 = vmatmul.f32.gmra.mxu1 %v2179_v42  ;;  %v2152_v42 = vld [vmem:[%s2566_s26 + $0x109] sm:$0xff] }
 0x1fd   : > { %v1684_v53 = vadd.f32 %v1589_v24, %v1102_v34  ;;  %1412 = vmatmul.f32.gmra.mxu2 %v2119_v9  ;;  %1525 = vmatmul.f32.gmra.mxu3 %v2151_v1  ;;  %v2121_v34 = vld [vmem:[%s2566_s26 + $0x110] sm:$0xff] }
 0x1fe   : > { %v1591_v7 = vpop.f32.mrf.mxu0  ;;  %v2153_v24 = vld [vmem:[%s2566_s26 + $0x111] sm:$0xff] }
 0x1ff   : > { %v1720_v57 = vadd.f32 %v3403_v56, %v1684_v53 }
 0x200   : > { %v1365_v41 = vpop.f32.mrf.mxu2  ;;  %v1478_v54 = vpop.f32.mrf.mxu3 }
 0x201   : > { %v1752_v18 = vmax.f32 %v1720_v57, 0.0  ;;  %v1479_v44 = vadd.f32 %v1478_v54, %v1365_v41  ;;  %v1107_v36 = vpop.f32.mrf.mxu1  ;;  %1638 = vmatmul.f32.gmra.mxu0 %v3408_v45  ;;  %v3429_v41 = vld [vmem:[%s2566_s26 + $0x112] sm:$0xff] }
 0x203   : > { %1784 = vst [vmem:[%s3415_s6] sm:$0xff] %v1752_v18  ;;  %v1592_v26 = vadd.f32 %v1591_v7, %v1479_v44 }
 0x204   : > { %1154 = vmatmul.f32.gmra.mxu1 %v2180_v47  ;;  %v1108_v47 = vadd.f32 %v1107_v36, %v3137_v39 }
 0x205   : > { %v1685_v19 = vadd.f32 %v1592_v26, %v1105_v38  ;;  %1415 = vmatmul.f32.gmra.mxu2 %v2120_v30  ;;  %1528 = vmatmul.f32.gmra.mxu3 %v2152_v42  ;;  %v2122_v42 = vld [vmem:[%s2566_s26 + $0x120] sm:$0xff] }
 0x206   : > { %v1594_v6 = vpop.f32.mrf.mxu0  ;;  %v2154_v38 = vld [vmem:[%s2566_s26 + $0x121] sm:$0xff] }
 0x207   : > { %v1721_v55 = vadd.f32 %v3403_v56, %v1685_v19 }
 0x208   : > { %v1368_v58 = vpop.f32.mrf.mxu2  ;;  %v1481_v21 = vpop.f32.mrf.mxu3 }
 0x209   : > { %v1753_v43 = vmax.f32 %v1721_v55, 0.0  ;;  %v1482_v9 = vadd.f32 %v1481_v21, %v1368_v58  ;;  %v1110_v1 = vpop.f32.mrf.mxu1  ;;  %1641 = vmatmul.f32.gmra.mxu0 %v3419_v61  ;;  %v3439_v55 = vld [vmem:[%s2566_s26 + $0x122] sm:$0xff] }
 0x20b   : > { %1785 = vst [vmem:[%s3415_s6 + $0x8] sm:$0xff] %v1753_v43  ;;  %v1595_v53 = vadd.f32 %v1594_v6, %v1482_v9 }
 0x20c   : > { %1157 = vmatmul.f32.gmra.mxu1 %v3384_v10  ;;  %v1111_v10 = vadd.f32 %v1110_v1, %v3149_v59 }
 0x20d   : > { %v1686_v7 = vadd.f32 %v1595_v53, %v1108_v47  ;;  %1418 = vmatmul.f32.gmra.mxu2 %v2121_v34  ;;  %1531 = vmatmul.f32.gmra.mxu3 %v2153_v24  ;;  %v2123_v34 = vld [vmem:[%s2566_s26 + $0x128] sm:$0xff] }
 0x20e   : > { %v1597_v57 = vpop.f32.mrf.mxu0  ;;  %v2155_v24 = vld [vmem:[%s2566_s26 + $0x129] sm:$0xff] }
 0x20f   : > { %v1722_v54 = vadd.f32 %v3403_v56, %v1686_v7 }
 0x210   : > { %v1371_v18 = vpop.f32.mrf.mxu2  ;;  %v1484_v44 = vpop.f32.mrf.mxu3 }
 0x211   : > { %v1754_v30 = vmax.f32 %v1722_v54, 0.0  ;;  %v1485_v39 = vadd.f32 %v1484_v44, %v1371_v18  ;;  %v1113_v36 = vpop.f32.mrf.mxu1  ;;  %1644 = vmatmul.f32.gmra.mxu0 %v3429_v41 }
 0x213   : > { %1786 = vst [vmem:[%s3415_s6 + $0x10] sm:$0xff] %v1754_v30  ;;  %v1598_v26 = vadd.f32 %v1597_v57, %v1485_v39  ;;  %v3449_v57 = vld [vmem:[%s2566_s26 + $0x12a] sm:$0xff] }
 0x214   : > { %1160 = vmatmul.f32.gmra.mxu1 %v3393_v11  ;;  %v1114_v11 = vadd.f32 %v1113_v36, %v3161_v40  ;;  %v2156_v36 = vld [vmem:[%s2566_s26 + $0x139] sm:$0xff] }
 0x215   : > { %v1687_v19 = vadd.f32 %v1598_v26, %v1111_v10  ;;  %1421 = vmatmul.f32.gmra.mxu2 %v2122_v42  ;;  %1534 = vmatmul.f32.gmra.mxu3 %v2154_v38  ;;  %v3459_v26 = vld [vmem:[%s2566_s26 + $0x13a] sm:$0xff] }
 0x216   : > { %v1600_v6 = vpop.f32.mrf.mxu0 }
 0x217   : > { %v1723_v58 = vadd.f32 %v3403_v56, %v1687_v19 }
 0x218   : > { %v1374_v21 = vpop.f32.mrf.mxu2  ;;  %v1487_v43 = vpop.f32.mrf.mxu3 }
 0x219   : > { %v1755_v9 = vmax.f32 %v1723_v58, 0.0  ;;  %v1488_v59 = vadd.f32 %v1487_v43, %v1374_v21  ;;  %v1116_v1 = vpop.f32.mrf.mxu1  ;;  %1647 = vmatmul.f32.gmra.mxu0 %v3439_v55 }
 0x21a   : > { %v1117_v42 = vadd.f32 %v1116_v1, %v3173_v50 }
 0x21b   : > { %1787 = vst [vmem:[%s3415_s6 + $0x18] sm:$0xff] %v1755_v9  ;;  %v1601_v47 = vadd.f32 %v1600_v6, %v1488_v59  ;;  %v2157_v9 = vld [vmem:[%s2566_s26 + $0x141] sm:$0xff] }
 0x21c   : > { %1163 = vmatmul.f32.gmra.mxu1 %v3408_v45 }
 0x21d   : > { %v1688_v53 = vadd.f32 %v1601_v47, %v1114_v11  ;;  %1424 = vmatmul.f32.gmra.mxu2 %v2123_v34  ;;  %1537 = vmatmul.f32.gmra.mxu3 %v2155_v24  ;;  %v3469_v34 = vld [vmem:[%s2566_s26 + $0x142] sm:$0xff] }
 0x21e   : > { %v1603_v7 = vpop.f32.mrf.mxu0 }
 0x21f   : > { %v1724_v54 = vadd.f32 %v3403_v56, %v1688_v53 }
 0x220   : > { %v1377_v18 = vpop.f32.mrf.mxu2  ;;  %v1490_v44 = vpop.f32.mrf.mxu3 }
 0x221   : > { %v1756_v30 = vmax.f32 %v1724_v54, 0.0  ;;  %v1491_v39 = vadd.f32 %v1490_v44, %v1377_v18  ;;  %v1119_v40 = vpop.f32.mrf.mxu1  ;;  %1650 = vmatmul.f32.gmra.mxu0 %v3449_v57  ;;  %v2158_v54 = vld [vmem:[%s2566_s26 + $0x151] sm:$0xff] }
 0x223   : > { %1788 = vst [vmem:[%s3415_s6 + $0x20] sm:$0xff] %v1756_v30  ;;  %v1604_v45 = vadd.f32 %v1603_v7, %v1491_v39  ;;  %v3479_v30 = vld [vmem:[%s2566_s26 + $0x152] sm:$0xff] }
 0x224   : > { %1166 = vmatmul.f32.gmra.mxu1 %v3419_v61  ;;  %v1120_v61 = vadd.f32 %v1119_v40, %v3185_v23 }
 0x225   : > { %v1689_v38 = vadd.f32 %v1604_v45, %v1117_v42  ;;  %1427 = vmatmul.f32.gmra.mxu2 %v3222_v14  ;;  %1540 = vmatmul.f32.gmra.mxu3 %v2156_v36 }
 0x226   : > { %v1606_v10 = vpop.f32.mrf.mxu0 }
 0x227   : > { %v1725_v19 = vadd.f32 %v3403_v56, %v1689_v38  ;;  %v2159_v38 = vld [vmem:[%s2566_s26 + $0x159] sm:$0xff] }
 0x228   : > { %v1380_v6 = vpop.f32.mrf.mxu2  ;;  %v1493_v58 = vpop.f32.mrf.mxu3 }
 0x229   : > { %v1757_v21 = vmax.f32 %v1725_v19, 0.0  ;;  %v1494_v50 = vadd.f32 %v1493_v58, %v1380_v6  ;;  %v1122_v43 = vpop.f32.mrf.mxu1  ;;  %1653 = vmatmul.f32.gmra.mxu0 %v3459_v26  ;;  %v3489_v6 = vld [vmem:[%s2566_s26 + $0x15a] sm:$0xff] }
 0x22b   : > { %1789 = vst [vmem:[%s3415_s6 + $0x28] sm:$0xff] %v1757_v21  ;;  %v1607_v14 = vadd.f32 %v1606_v10, %v1494_v50 }
 0x22c   : > { %1169 = vmatmul.f32.gmra.mxu1 %v3429_v41  ;;  %v1123_v41 = vadd.f32 %v1122_v43, %v3197_v13 }
 0x22d   : > { %v1690_v59 = vadd.f32 %v1607_v14, %v1120_v61  ;;  %1430 = vmatmul.f32.gmra.mxu2 %v3237_v27  ;;  %1543 = vmatmul.f32.gmra.mxu3 %v2157_v9  ;;  %v2160_v61 = vld [vmem:[%s2566_s26 + $0x169] sm:$0xff] }
 0x22e   : > { %v1609_v1 = vpop.f32.mrf.mxu0 }
 0x22f   : > { %v1726_v24 = vadd.f32 %v3403_v56, %v1690_v59 }
 0x230   : > { %v1383_v11 = vpop.f32.mrf.mxu2  ;;  %v1496_v47 = vpop.f32.mrf.mxu3 }
 0x231   : > { %v1758_v53 = vmax.f32 %v1726_v24, 0.0  ;;  %v1497_v23 = vadd.f32 %v1496_v47, %v1383_v11  ;;  %v1125_v7 = vpop.f32.mrf.mxu1  ;;  %1656 = vmatmul.f32.gmra.mxu0 %v3469_v34 }
 0x233   : > { %1790 = vst [vmem:[%s3415_s6 + $0x30] sm:$0xff] %v1758_v53  ;;  %v1610_v27 = vadd.f32 %v1609_v1, %v1497_v23  ;;  %v3499_v1 = vld [vmem:[%s2566_s26 + $0x16a] sm:$0xff] }
 0x234   : > { %1172 = vmatmul.f32.gmra.mxu1 %v3439_v55  ;;  %v1126_v55 = vadd.f32 %v1125_v7, %v3209_v46  ;;  %v2161_v7 = vld [vmem:[%s2566_s26 + $0x171] sm:$0xff] }
 0x235   : > { %v1691_v18 = vadd.f32 %v1610_v27, %v1123_v41  ;;  %1433 = vmatmul.f32.gmra.mxu2 %v3252_v25  ;;  %1546 = vmatmul.f32.gmra.mxu3 %v2158_v54  ;;  %v3509_v27 = vld [vmem:[%s2566_s26 + $0x172] sm:$0xff] }
 0x236   : > { %v1612_v44 = vpop.f32.mrf.mxu0 }
 0x237   : > { %v1727_v39 = vadd.f32 %v3403_v56, %v1691_v18 }
 0x238   : > { %v1386_v40 = vpop.f32.mrf.mxu2  ;;  %v1499_v36 = vpop.f32.mrf.mxu3 }
 0x239   : > { %v1759_v42 = vmax.f32 %v1727_v39, 0.0  ;;  %v1500_v13 = vadd.f32 %v1499_v36, %v1386_v40  ;;  %v1128_v45 = vpop.f32.mrf.mxu1  ;;  %1659 = vmatmul.f32.gmra.mxu0 %v3479_v30 }
 0x23b   : > { %1791 = vst [vmem:[%s3415_s6 + $0x38] sm:$0xff] %v1759_v42  ;;  %v1613_v25 = vadd.f32 %v1612_v44, %v1500_v13  ;;  %v2130_v42 = vld [vmem:[%s2566_s26 + $0x180] sm:$0xff] }
 0x23c   : > { %1175 = vmatmul.f32.gmra.mxu1 %v3449_v57  ;;  %v1129_v57 = vadd.f32 %v1128_v45, %v3224_v3 }
 0x23d   : > { %v1692_v10 = vadd.f32 %v1613_v25, %v1126_v55  ;;  %1436 = vmatmul.f32.gmra.mxu2 %v3261_v48  ;;  %1549 = vmatmul.f32.gmra.mxu3 %v2159_v38  ;;  %v2194_v55 = vld [vmem:[%s2566_s26 + $0x182] sm:$0xff] }
 0x23e   : > { %v1615_v19 = vpop.f32.mrf.mxu0 }
 0x23f   : > { %v1728_v58 = vadd.f32 %v3403_v56, %v1692_v10 }
 0x240   : > { %v1389_v21 = vpop.f32.mrf.mxu2  ;;  %v1502_v50 = vpop.f32.mrf.mxu3 }
 0x241   : > { %v1760_v43 = vmax.f32 %v1728_v58, 0.0  ;;  %v1503_v46 = vadd.f32 %v1502_v50, %v1389_v21  ;;  %v1131_v9 = vpop.f32.mrf.mxu1  ;;  %1662 = vmatmul.f32.gmra.mxu0 %v3489_v6  ;;  %v2131_v50 = vld [vmem:[%s2566_s26 + $0x188] sm:$0xff] }
 0x243   : > { %1792 = vst [vmem:[%s3415_s6 + $0x40] sm:$0xff] %v1760_v43  ;;  %v1616_v48 = vadd.f32 %v1615_v19, %v1503_v46  ;;  %v2163_v43 = vld [vmem:[%s2566_s26 + $0x189] sm:$0xff] }
 0x244   : > { %1178 = vmatmul.f32.gmra.mxu1 %v3459_v26  ;;  %v1132_v26 = vadd.f32 %v1131_v9, %v3239_v16 }
 0x245   : > { %v1693_v14 = vadd.f32 %v1616_v48, %v1129_v57  ;;  %1439 = vmatmul.f32.gmra.mxu2 %v3270_v52  ;;  %1552 = vmatmul.f32.gmra.mxu3 %v2160_v61  ;;  %v2195_v57 = vld [vmem:[%s2566_s26 + $0x18a] sm:$0xff] }
 0x246   : > { %v1618_v59 = vpop.f32.mrf.mxu0 }
 0x247   : > { %v1729_v24 = vadd.f32 %v3403_v56, %v1693_v14 }
 0x248   : > { %v1392_v11 = vpop.f32.mrf.mxu2  ;;  %v1505_v47 = vpop.f32.mrf.mxu3 }
 0x249   : > { %v1761_v53 = vmax.f32 %v1729_v24, 0.0  ;;  %v1506_v3 = vadd.f32 %v1505_v47, %v1392_v11  ;;  %v1134_v23 = vpop.f32.mrf.mxu1  ;;  %1665 = vmatmul.f32.gmra.mxu0 %v3499_v1  ;;  %v2132_v47 = vld [vmem:[%s2566_s26 + $0x198] sm:$0xff] }
 0x24a   : > { %v1135_v13 = vadd.f32 %v1134_v23, %v3254_v5 }
 0x24b   : > { %1793 = vst [vmem:[%s3415_s6 + $0x48] sm:$0xff] %v1761_v53  ;;  %v1619_v52 = vadd.f32 %v1618_v59, %v1506_v3  ;;  %v2164_v53 = vld [vmem:[%s2566_s26 + $0x199] sm:$0xff] }
 0x24c   : > { %1181 = vmatmul.f32.gmra.mxu1 %v3469_v34  ;;  %v2162_v34 = vld [vmem:[%s2566_s26 + $0x181] sm:$0xff] }
 0x24d   : > { %v1694_v54 = vadd.f32 %v1619_v52, %v1132_v26  ;;  %1442 = vmatmul.f32.gmra.mxu2 %v3279_v20  ;;  %1555 = vmatmul.f32.gmra.mxu3 %v2161_v7  ;;  %v2196_v26 = vld [vmem:[%s2566_s26 + $0x19a] sm:$0xff] }
 0x24e   : > { %v1621_v41 = vpop.f32.mrf.mxu0 }
 0x24f   : > { %v1730_v18 = vadd.f32 %v3403_v56, %v1694_v54 }
 0x250   : > { %v1395_v44 = vpop.f32.mrf.mxu2  ;;  %v1508_v39 = vpop.f32.mrf.mxu3 }
 0x251   : > { %v1762_v16 = vmax.f32 %v1730_v18, 0.0  ;;  %v1509_v40 = vadd.f32 %v1508_v39, %v1395_v44  ;;  %v1137_v36 = vpop.f32.mrf.mxu1  ;;  %1668 = vmatmul.f32.gmra.mxu0 %v3509_v27  ;;  %v2133_v39 = vld [vmem:[%s2566_s26 + $0x1a0] sm:$0xff] }
 0x252   : > { %v1138_v46 = vadd.f32 %v1137_v36, %v3263_v33 }
 0x253   : > { %1794 = vst [vmem:[%s3415_s6 + $0x50] sm:$0xff] %v1762_v16  ;;  %v1622_v20 = vadd.f32 %v1621_v41, %v1509_v40  ;;  %v2165_v16 = vld [vmem:[%s2566_s26 + $0x1a1] sm:$0xff] }
 0x254   : > { %1184 = vmatmul.f32.gmra.mxu1 %v3479_v30 }
 0x255   : > { %v1695_v45 = vadd.f32 %v1622_v20, %v1135_v13  ;;  %1445 = vmatmul.f32.gmra.mxu2 %v2130_v42  ;;  %1558 = vmatmul.f32.gmra.mxu3 %v2162_v34  ;;  %v2197_v34 = vld [vmem:[%s2566_s26 + $0x1a2] sm:$0xff]  ;;  %s2251_s26 = sshll.u32 %s2429_s15, 8  ;;  %s1817_s15 = scalar_lea.sflag [#allocation3], %s208_s29 }
 0x256   : > { %v1624_v38 = vpop.f32.mrf.mxu0  ;;  %s1831_s9 = scalar_lea.hbm %s3635_s3, %s2251_s26 }
 0x257   : > { %v1731_v25 = vadd.f32 %v3403_v56, %v1695_v45  ;;  %s1834_s11 = sshll.u32 %s1831_s9, 4  ;;  %s1835_s11 = int_to_ptr.hbm [resolvable:$true] %s1834_s11 }
 0x258   : > { %v1398_v10 = vpop.f32.mrf.mxu2  ;;  %v1511_v19 = vpop.f32.mrf.mxu3  ;;  %s2373_s18 = sshra.s32 %s1835_s11, 4  ;;  %s2374_s18 = int_to_ptr.hbm [resolvable:$true] %s2373_s18 }
 0x259   : > { %v1763_v58 = vmax.f32 %v1731_v25, 0.0  ;;  %v1512_v21 = vadd.f32 %v1511_v19, %v1398_v10  ;;  %v1140_v5 = vpop.f32.mrf.mxu1  ;;  %1671 = vmatmul.f32.gmra.mxu0 %v2194_v55  ;;  %s2375_s19 = scalar_lea.hbm %s2374_s18, 256  ;;  %p2380_p1 = scmp.lt.s32.totalorder %s2374_s18, %s3635_s3 }
 0x25a   : > { %v1141_v3 = vadd.f32 %v1140_v5, %v3272_v62  ;;  %p2376_p12 = scmp.ne.s32.totalorder %s2374_s18, %s2375_s19  ;;  %p2381_p2 = scmp.lt.s32.totalorder %s2379_s27, %s2375_s19 }
 0x25b   : > { %1795 = vst [vmem:[%s3415_s6 + $0x58] sm:$0xff] %v1763_v58  ;;  %v1625_v30 = vadd.f32 %v1624_v38, %v1512_v21 }
 0x25c   : > { %1187 = vmatmul.f32.gmra.mxu1 %v3489_v6  ;;  %p2377_p13 = pnand %p2376_p12, %p2501_p4  ;;  %p2382_p3 = por %p2381_p2, %p2380_p1 }
 0x25d   : > { %v1696_v9 = vadd.f32 %v1625_v30, %v1138_v46  ;;  %1448 = vmatmul.f32.gmra.mxu2 %v2131_v50  ;;  %1561 = vmatmul.f32.gmra.mxu3 %v2163_v43 }
 0x25e   : > { %v1627_v61 = vpop.f32.mrf.mxu0  ;;  %p2378_p0 = pneg %p2377_p13 }
 0x25f   : > { %v1732_v48 = vadd.f32 %v3403_v56, %v1696_v9 }
 0x260   : > { %v1401_v14 = vpop.f32.mrf.mxu2  ;;  %v1514_v59 = vpop.f32.mrf.mxu3  ;;  %p2383_p5 = pnand %p2382_p3, %p2378_p0 }
 0x261   : > { %v1764_v24 = vmax.f32 %v1732_v48, 0.0  ;;  %v1515_v11 = vadd.f32 %v1514_v59, %v1401_v14  ;;  %v1143_v33 = vpop.f32.mrf.mxu1  ;;  %1674 = vmatmul.f32.gmra.mxu0 %v2195_v57 }
 0x262   : > { %v1144_v40 = vadd.f32 %v1143_v33, %v3281_v22 }
 0x263   : > { %1796 = vst [vmem:[%s3415_s6 + $0x60] sm:$0xff] %v1764_v24  ;;  %v1628_v6 = vadd.f32 %v1627_v61, %v1515_v11 }
 0x264   : > { %1190 = vmatmul.f32.gmra.mxu1 %v3499_v1 }
 0x265   : > { %v1697_v23 = vadd.f32 %v1628_v6, %v1141_v3  ;;  %1451 = vmatmul.f32.gmra.mxu2 %v2132_v47  ;;  %1564 = vmatmul.f32.gmra.mxu3 %v2164_v53 }
 0x266   : > { %v1630_v7 = vpop.f32.mrf.mxu0 }
 0x267   : > { %v1733_v52 = vadd.f32 %v3403_v56, %v1697_v23 }
 0x268   : > { %v1404_v54 = vpop.f32.mrf.mxu2  ;;  %v1517_v41 = vpop.f32.mrf.mxu3 }
 0x269   : > { %v1765_v18 = vmax.f32 %v1733_v52, 0.0  ;;  %v1518_v44 = vadd.f32 %v1517_v41, %v1404_v54  ;;  %v1146_v62 = vpop.f32.mrf.mxu1  ;;  %1677 = vmatmul.f32.gmra.mxu0 %v2196_v26 }
 0x26a   : > { %v1147_v22 = vadd.f32 %v1146_v62, %v3288_v12 }
 0x26b   : > { %1797 = vst [vmem:[%s3415_s6 + $0x68] sm:$0xff] %v1765_v18  ;;  %v1631_v1 = vadd.f32 %v1630_v7, %v1518_v44 }
 0x26c   : > { %1193 = vmatmul.f32.gmra.mxu1 %v3509_v27 }
 0x26d   : > { %v1698_v36 = vadd.f32 %v1631_v1, %v1144_v40  ;;  %1454 = vmatmul.f32.gmra.mxu2 %v2133_v39  ;;  %1567 = vmatmul.f32.gmra.mxu3 %v2165_v16 }
 0x26e   : > { %v1633_v42 = vpop.f32.mrf.mxu0 }
 0x26f   : > { %v1734_v13 = vadd.f32 %v3403_v56, %v1698_v36 }
 0x270   : > { %v1407_v20 = vpop.f32.mrf.mxu2  ;;  %v1520_v45 = vpop.f32.mrf.mxu3 }
 0x271   : > { %v1766_v38 = vmax.f32 %v1734_v13, 0.0  ;;  %v1521_v55 = vadd.f32 %v1520_v45, %v1407_v20  ;;  %v1149_v25 = vpop.f32.mrf.mxu1  ;;  %1680 = vmatmul.f32.gmra.mxu0 %v2197_v34 }
 0x272   : > { %v1150_v30 = vadd.f32 %v1149_v25, %v3295_v49 }
 0x273   : > { %1798 = vst [vmem:[%s3415_s6 + $0x70] sm:$0xff] %v1766_v38  ;;  %v1634_v10 = vadd.f32 %v1633_v42, %v1521_v55 }
 0x275   : > { %v1699_v19 = vadd.f32 %v1634_v10, %v1147_v22 }
 0x276   : > { %v1636_v27 = vpop.f32.mrf.mxu0 }
 0x277   : > { %v1735_v58 = vadd.f32 %v3403_v56, %v1699_v19 }
 0x278   : > { %v1410_v21 = vpop.f32.mrf.mxu2  ;;  %v1523_v5 = vpop.f32.mrf.mxu3 }
 0x279   : > { %v1767_v50 = vmax.f32 %v1735_v58, 0.0  ;;  %v1524_v43 = vadd.f32 %v1523_v5, %v1410_v21  ;;  %v1152_v46 = vpop.f32.mrf.mxu1 }
 0x27a   : > { %v1153_v33 = vadd.f32 %v1152_v46, %v3302_v31 }
 0x27b   : > { %1799 = vst [vmem:[%s3415_s6 + $0x78] sm:$0xff] %v1767_v50  ;;  %v1637_v9 = vadd.f32 %v1636_v27, %v1524_v43 }
 0x27d   : > { %v1700_v61 = vadd.f32 %v1637_v9, %v1150_v30 }
 0x27e   : > { %v1639_v57 = vpop.f32.mrf.mxu0 }
 0x27f   : > { %v1736_v12 = vadd.f32 %v3403_v56, %v1700_v61 }
 0x280   : > { %v1413_v48 = vpop.f32.mrf.mxu2  ;;  %v1526_v14 = vpop.f32.mrf.mxu3 }
 0x281   : > { %v1768_v59 = vmax.f32 %v1736_v12, 0.0  ;;  %v1527_v24 = vadd.f32 %v1526_v14, %v1413_v48  ;;  %v1155_v11 = vpop.f32.mrf.mxu1 }
 0x282   : > { %v1156_v54 = vadd.f32 %v1155_v11, %v3309_v8 }
 0x283   : > { %1800 = vst [vmem:[%s3415_s6 + $0x80] sm:$0xff] %v1768_v59  ;;  %v1640_v47 = vadd.f32 %v1639_v57, %v1527_v24 }
 0x285   : > { %v1701_v53 = vadd.f32 %v1640_v47, %v1153_v33 }
 0x286   : > { %v1642_v3 = vpop.f32.mrf.mxu0 }
 0x287   : > { %v1737_v49 = vadd.f32 %v3403_v56, %v1701_v53 }
 0x288   : > { %v1416_v6 = vpop.f32.mrf.mxu2  ;;  %v1529_v23 = vpop.f32.mrf.mxu3 }
 0x289   : > { %v1769_v7 = vmax.f32 %v1737_v49, 0.0  ;;  %v1530_v26 = vadd.f32 %v1529_v23, %v1416_v6  ;;  %v1158_v52 = vpop.f32.mrf.mxu1 }
 0x28a   : > { %v1159_v36 = vadd.f32 %v1158_v52, %v3315_v63 }
 0x28b   : > { %1801 = vst [vmem:[%s3415_s6 + $0x88] sm:$0xff] %v1769_v7  ;;  %v1643_v41 = vadd.f32 %v1642_v3, %v1530_v26 }
 0x28d   : > { %v1702_v18 = vadd.f32 %v1643_v41, %v1156_v54 }
 0x28e   : > { %v1645_v44 = vpop.f32.mrf.mxu0 }
 0x28f   : > { %v1738_v31 = vadd.f32 %v3403_v56, %v1702_v18 }
 0x290   : > { %v1419_v62 = vpop.f32.mrf.mxu2  ;;  %v1532_v39 = vpop.f32.mrf.mxu3 }
 0x291   : > { %v1770_v16 = vmax.f32 %v1738_v31, 0.0  ;;  %v1533_v40 = vadd.f32 %v1532_v39, %v1419_v62  ;;  %v1161_v1 = vpop.f32.mrf.mxu1 }
 0x292   : > { %v1162_v22 = vadd.f32 %v1161_v1, %v3321_v29 }
 0x293   : > { %1802 = vst [vmem:[%s3415_s6 + $0x90] sm:$0xff] %v1770_v16  ;;  %v1646_v42 = vadd.f32 %v1645_v44, %v1533_v40 }
 0x295   : > { %v1703_v34 = vadd.f32 %v1646_v42, %v1159_v36 }
 0x296   : > { %v1648_v13 = vpop.f32.mrf.mxu0 }
 0x297   : > { %v1739_v8 = vadd.f32 %v3403_v56, %v1703_v34 }
 0x298   : > { %v1422_v20 = vpop.f32.mrf.mxu2  ;;  %v1535_v45 = vpop.f32.mrf.mxu3 }
 0x299   : > { %v1771_v38 = vmax.f32 %v1739_v8, 0.0  ;;  %v1536_v55 = vadd.f32 %v1535_v45, %v1422_v20  ;;  %v1164_v25 = vpop.f32.mrf.mxu1 }
 0x29a   : > { %v1165_v46 = vadd.f32 %v1164_v25, %v3327_v2 }
 0x29b   : > { %1803 = vst [vmem:[%s3415_s6 + $0x98] sm:$0xff] %v1771_v38  ;;  %v1649_v10 = vadd.f32 %v1648_v13, %v1536_v55 }
 0x29d   : > { %v1704_v19 = vadd.f32 %v1649_v10, %v1162_v22 }
 0x29e   : > { %v1651_v27 = vpop.f32.mrf.mxu0 }
 0x29f   : > { %v1740_v63 = vadd.f32 %v3403_v56, %v1704_v19 }
 0x2a0   : > { %v1425_v58 = vpop.f32.mrf.mxu2  ;;  %v1538_v21 = vpop.f32.mrf.mxu3 }
 0x2a1   : > { %v1772_v5 = vmax.f32 %v1740_v63, 0.0  ;;  %v1539_v50 = vadd.f32 %v1538_v21, %v1425_v58  ;;  %v1167_v43 = vpop.f32.mrf.mxu1 }
 0x2a2   : > { %v1168_v24 = vadd.f32 %v1167_v43, %v3333_v17 }
 0x2a3   : > { %1804 = vst [vmem:[%s3415_s6 + $0xa0] sm:$0xff] %v1772_v5  ;;  %v1652_v30 = vadd.f32 %v1651_v27, %v1539_v50 }
 0x2a5   : > { %v1705_v9 = vadd.f32 %v1652_v30, %v1165_v46 }
 0x2a6   : > { %v1654_v61 = vpop.f32.mrf.mxu0 }
 0x2a7   : > { %v1741_v29 = vadd.f32 %v3403_v56, %v1705_v9 }
 0x2a8   : > { %v1428_v57 = vpop.f32.mrf.mxu2  ;;  %v1541_v12 = vpop.f32.mrf.mxu3 }
 0x2a9   : > { %v1773_v48 = vmax.f32 %v1741_v29, 0.0  ;;  %v1542_v14 = vadd.f32 %v1541_v12, %v1428_v57  ;;  %v1170_v59 = vpop.f32.mrf.mxu1 }
 0x2aa   : > { %v1171_v7 = vadd.f32 %v1170_v59, %v3339_v32 }
 0x2ab   : > { %1805 = vst [vmem:[%s3415_s6 + $0xa8] sm:$0xff] %v1773_v48  ;;  %v1655_v11 = vadd.f32 %v1654_v61, %v1542_v14 }
 0x2ad   : > { %v1706_v33 = vadd.f32 %v1655_v11, %v1168_v24 }
 0x2ae   : > { %v1657_v47 = vpop.f32.mrf.mxu0 }
 0x2af   : > { %v1742_v2 = vadd.f32 %v3403_v56, %v1706_v33 }
 0x2b0   : > { %v1431_v53 = vpop.f32.mrf.mxu2  ;;  %v1544_v3 = vpop.f32.mrf.mxu3 }
 0x2b1   : > { %v1774_v49 = vmax.f32 %v1742_v2, 0.0  ;;  %v1545_v6 = vadd.f32 %v1544_v3, %v1431_v53  ;;  %v1173_v23 = vpop.f32.mrf.mxu1 }
 0x2b2   : > { %v1174_v39 = vadd.f32 %v1173_v23, %v3345_v4 }
 0x2b3   : > { %1806 = vst [vmem:[%s3415_s6 + $0xb0] sm:$0xff] %v1774_v49  ;;  %v1658_v26 = vadd.f32 %v1657_v47, %v1545_v6 }
 0x2b5   : > { %v1707_v52 = vadd.f32 %v1658_v26, %v1171_v7 }
 0x2b6   : > { %v1660_v54 = vpop.f32.mrf.mxu0 }
 0x2b7   : > { %v1743_v17 = vadd.f32 %v3403_v56, %v1707_v52 }
 0x2b8   : > { %v1434_v41 = vpop.f32.mrf.mxu2  ;;  %v1547_v18 = vpop.f32.mrf.mxu3 }
 0x2b9   : > { %v1775_v44 = vmax.f32 %v1743_v17, 0.0  ;;  %v1548_v31 = vadd.f32 %v1547_v18, %v1434_v41  ;;  %v1176_v62 = vpop.f32.mrf.mxu1 }
 0x2ba   : > { %v1177_v20 = vadd.f32 %v1176_v62, %v3351_v0 }
 0x2bb   : > { %1807 = vst [vmem:[%s3415_s6 + $0xb8] sm:$0xff] %v1775_v44  ;;  %v1661_v16 = vadd.f32 %v1660_v54, %v1548_v31 }
 0x2bd   : > { %v1708_v40 = vadd.f32 %v1661_v16, %v1174_v39 }
 0x2be   : > { %v1663_v1 = vpop.f32.mrf.mxu0 }
 0x2bf   : > { %v1744_v32 = vadd.f32 %v3403_v56, %v1708_v40 }
 0x2c0   : > { %v1437_v36 = vpop.f32.mrf.mxu2  ;;  %v1550_v42 = vpop.f32.mrf.mxu3 }
 0x2c1   : > { %v1776_v34 = vmax.f32 %v1744_v32, 0.0  ;;  %v1551_v13 = vadd.f32 %v1550_v42, %v1437_v36  ;;  %v1179_v8 = vpop.f32.mrf.mxu1 }
 0x2c2   : > { %v1180_v63 = vadd.f32 %v1179_v8, %v3357_v60 }
 0x2c3   : > { %1808 = vst [vmem:[%s3415_s6 + $0xc0] sm:$0xff] %v1776_v34  ;;  %v1664_v45 = vadd.f32 %v1663_v1, %v1551_v13 }
 0x2c5   : > { %v1709_v38 = vadd.f32 %v1664_v45, %v1177_v20 }
 0x2c6   : > { %v1666_v55 = vpop.f32.mrf.mxu0 }
 0x2c7   : > { %v1745_v4 = vadd.f32 %v3403_v56, %v1709_v38 }
 0x2c8   : > { %v1440_v25 = vpop.f32.mrf.mxu2  ;;  %v1553_v22 = vpop.f32.mrf.mxu3 }
 0x2c9   : > { %v1777_v10 = vmax.f32 %v1745_v4, 0.0  ;;  %v1554_v19 = vadd.f32 %v1553_v22, %v1440_v25  ;;  %v1182_v27 = vpop.f32.mrf.mxu1 }
 0x2ca   : > { %v1183_v61 = vadd.f32 %v1182_v27, %v3363_v51 }
 0x2cb   : > { %1809 = vst [vmem:[%s3415_s6 + $0xc8] sm:$0xff] %v1777_v10  ;;  %v1667_v58 = vadd.f32 %v1666_v55, %v1554_v19 }
 0x2cd   : > { %v1710_v21 = vadd.f32 %v1667_v58, %v1180_v63 }
 0x2ce   : > { %v1669_v5 = vpop.f32.mrf.mxu0 }
 0x2cf   : > { %v1746_v0 = vadd.f32 %v3403_v56, %v1710_v21 }
 0x2d0   : > { %v1443_v50 = vpop.f32.mrf.mxu2  ;;  %v1556_v43 = vpop.f32.mrf.mxu3 }
 0x2d1   : > { %v1778_v46 = vmax.f32 %v1746_v0, 0.0  ;;  %v1557_v30 = vadd.f32 %v1556_v43, %v1443_v50  ;;  %v1185_v9 = vpop.f32.mrf.mxu1 }
 0x2d2   : > { %v1186_v11 = vadd.f32 %v1185_v9, %v3369_v35 }
 0x2d3   : > { %1810 = vst [vmem:[%s3415_s6 + $0xd0] sm:$0xff] %v1778_v46  ;;  %v1670_v29 = vadd.f32 %v1669_v5, %v1557_v30 }
 0x2d5   : > { %v1711_v57 = vadd.f32 %v1670_v29, %v1183_v61 }
 0x2d6   : > { %v1672_v12 = vpop.f32.mrf.mxu0 }
 0x2d7   : > { %v1747_v60 = vadd.f32 %v3403_v56, %v1711_v57 }
 0x2d8   : > { %v1446_v48 = vpop.f32.mrf.mxu2  ;;  %v1559_v14 = vpop.f32.mrf.mxu3 }
 0x2d9   : > { %v1779_v59 = vmax.f32 %v1747_v60, 0.0  ;;  %v1560_v24 = vadd.f32 %v1559_v14, %v1446_v48  ;;  %v1188_v33 = vpop.f32.mrf.mxu1 }
 0x2da   : > { %v1189_v7 = vadd.f32 %v1188_v33, %v3375_v37 }
 0x2db   : > { %1811 = vst [vmem:[%s3415_s6 + $0xd8] sm:$0xff] %v1779_v59  ;;  %v1673_v47 = vadd.f32 %v1672_v12, %v1560_v24 }
 0x2dd   : > { %v1712_v2 = vadd.f32 %v1673_v47, %v1186_v11 }
 0x2de   : > { %v1675_v53 = vpop.f32.mrf.mxu0 }
 0x2df   : > { %v1748_v51 = vadd.f32 %v3403_v56, %v1712_v2 }
 0x2e0   : > { %v1449_v3 = vpop.f32.mrf.mxu2  ;;  %v1562_v49 = vpop.f32.mrf.mxu3 }
 0x2e1   : > { %v1780_v6 = vmax.f32 %v1748_v51, 0.0  ;;  %v1563_v23 = vadd.f32 %v1562_v49, %v1449_v3  ;;  %v1191_v52 = vpop.f32.mrf.mxu1 }
 0x2e2   : > { %v1192_v62 = vadd.f32 %v1191_v52, %v3381_v15 }
 0x2e3   : > { %1812 = vst [vmem:[%s3415_s6 + $0xe0] sm:$0xff] %v1780_v6  ;;  %v1676_v26 = vadd.f32 %v1675_v53, %v1563_v23 }
 0x2e5   : > { %v1713_v54 = vadd.f32 %v1676_v26, %v1189_v7 }
 0x2e6   : > { %v1678_v35 = vpop.f32.mrf.mxu0 }
 0x2e7   : > { %v1749_v17 = vadd.f32 %v3403_v56, %v1713_v54 }
 0x2e8   : > { %v1452_v41 = vpop.f32.mrf.mxu2  ;;  %v1565_v18 = vpop.f32.mrf.mxu3 }
 0x2e9   : > { %v1781_v44 = vmax.f32 %v1749_v17, 0.0  ;;  %v1566_v31 = vadd.f32 %v1565_v18, %v1452_v41  ;;  %v1194_v37 = vpop.f32.mrf.mxu1 }
 0x2ea   : > { %v1195_v15 = vadd.f32 %v1194_v37, %v3390_v28 }
 0x2eb   : > { %1813 = vst [vmem:[%s3415_s6 + $0xe8] sm:$0xff] %v1781_v44  ;;  %v1679_v39 = vadd.f32 %v1678_v35, %v1566_v31 }
 0x2ed   : > { %v1714_v16 = vadd.f32 %v1679_v39, %v1192_v62 }
 0x2ee   : > { %v1681_v1 = vpop.f32.mrf.mxu0 }
 0x2ef   : > { %v1750_v40 = vadd.f32 %v3403_v56, %v1714_v16 }
 0x2f0   : > { %v1455_v32 = vpop.f32.mrf.mxu2  ;;  %v1568_v36 = vpop.f32.mrf.mxu3 }
 0x2f1   : > { %v1782_v42 = vmax.f32 %v1750_v40, 0.0  ;;  %v1569_v34 = vadd.f32 %v1568_v36, %v1455_v32 }
 0x2f3   : > { %1814 = vst [vmem:[%s3415_s6 + $0xf0] sm:$0xff] %v1782_v42  ;;  %v1682_v13 = vadd.f32 %v1681_v1, %v1569_v34 }
 0x2f5   : > { %v1715_v8 = vadd.f32 %v1682_v13, %v1195_v15 }
 0x2f7   : > { %v1751_v20 = vadd.f32 %v3403_v56, %v1715_v8 }
 0x2f9   : > { %v1783_v45 = vmax.f32 %v1751_v20, 0.0 }
 0x2fb   : > { %1815 = vst [vmem:[%s3415_s6 + $0xf8] sm:$0xff] %v1783_v45 }
 0x2fc   : > { %2386 = shalt.err (!%p2383_p5)
}
 0x2fd   : > { %s2439_s29 = smov 128   ;;  %s2440_s4 = smov 8  }
 0x2fe   : > { %2301 = dma.vmem_to_hbm [thread:$0]  (%p2501_p4), %s1833_s10, 4096, %s1835_s11, %s1817_s15, %s2439_s29, %s2439_s29, %s2440_s4  }
 0x2ff PF: > { %p2307_p6 = scmp.ge.s32.totalorder %s2437_s17, 2  ;;  %s1849_s5 = sand.u32 1, %s2417_s12  }
 0x300   : > { %s1850_s6 = scalar_lea.sflag [#allocation3], %s1849_s5 }
 0x301   : > { %p2304_p7 = pnand %p2307_p6, %p2508_p8 }
 0x303   : > { %p2305_p9 = pneg %p2304_p7 }
 0x305   : > { %2412 = dma.done.wait (%p2305_p9), %s1850_s6, 4096  }
 0x306   : > { %2414 = vsyncadd (%p2305_p9), %s1850_s6, 4294963200  ;;  %s16_s17 = sadd.s32 1, %s2437_s17   ;;  %s3638_s12 = smov %s2421_s13 }
 0x307   : > { %p13_p10 = scmp.ge.s32.totalorder %s16_s17, 4   ;;  %s3639_s13 = smov %s2425_s14 }
 0x308   : > { %s3640_s14 = smov %s2514_s25  ;;  %s3641_s15 = smov %s2433_s16 }
 0x309   : > { %s3642_s16 = smov %s3644_s20  ;;  %15 = sbr.rel (!%p13_p10) target bundleno = 4 (0x4), region = 78 }
 0x30e   :  { %1856 = vsyncpa [#allocation3], 1 }
 0x30f   :  { %1858 = vsyncpa [#allocation3 + $0x1], 1 }

</bundles_post_ra>
